<compile_context>
chip_gen: v5e
topology: v5e:2x2
jax: 0.10.0
libtpu: 0.0.40
codegen_flags: <defaults>
</compile_context>

<pallas_src>
import math

import jax
import jax.numpy as jnp
from jax import lax
from jax.experimental import pallas as pl
from jax.experimental.pallas import tpu as pltpu


def _make_mha_kernel(n_heads, d_k, exact_recip):
    """Kernel factory; n_heads / d_k / reciprocal mode are compile-time."""

    def kernel(q_ref, k_hbm, v_hbm,
               wq_ref, wk_ref, wv_ref, wo_ref,
               bq_ref, bk_ref, bv_ref, bo_ref,
               o_ref,
               kraw_ref, vraw_ref, kp_ref, vp_ref, ctx_ref, sem):
        """One (batch, query-tile) grid step.

        VMEM / HBM views:
          q_ref:             (1, TQ, D)  input dtype (cast to compute dtype here)
          k_hbm, v_hbm:      (B, S, D)   HBM (memory_space=pl.ANY)
          wq/wk/wv/wo_ref:   (D, D)      compute dtype ([in, out]; scale in wq)
          bq/bk/bv/bo_ref:   (1, D)      float32 (scale folded into bq)
          o_ref:             (1, TQ, D)  output dtype
          kraw/vraw_ref:     (S, D)      input-dtype raw K/V staging (per batch)
          kp/vp_ref:         (S, D)      compute-dtype projected K/V (lane-dense)
          ctx_ref:           (TQ, D)     compute-dtype packed per-head contexts
          sem:               DMA semaphores (2,)
        """
        cdt = kp_ref.dtype
        b = pl.program_id(0)
        qi = pl.program_id(1)

        # ---- Project K and V once per batch (first query tile). ------------
        # Raw K/V live in HBM; one overlapped DMA pair per batch into reused
        # staging buffers, then two full-width (S, D) x (D, D) GEMMs.
        @pl.when(qi == 0)
        def _():
            kcp = pltpu.make_async_copy(k_hbm.at[b], kraw_ref, sem.at[0])
            vcp = pltpu.make_async_copy(v_hbm.at[b], vraw_ref, sem.at[1])
            kcp.start()
            vcp.start()
            kcp.wait()
            kp_ref[...] = (jnp.dot(kraw_ref[...].astype(cdt), wk_ref[...],
                                   preferred_element_type=jnp.float32)
                           + bk_ref[...]).astype(cdt)
            vcp.wait()
            vp_ref[...] = (jnp.dot(vraw_ref[...].astype(cdt), wv_ref[...],
                                   preferred_element_type=jnp.float32)
                           + bv_ref[...]).astype(cdt)

        # ---- Q projection: one full-width GEMM (scale folded into wq/bq). --
        qb = q_ref[0].astype(cdt)                                    # (TQ, D)
        qp = (jnp.dot(qb, wq_ref[...], preferred_element_type=jnp.float32)
              + bq_ref[...]).astype(cdt)                             # (TQ, D)

        # ---- Per-head attention; contexts packed lane-dense into ctx_ref. --
        for h in range(n_heads):                 # static unroll (small H here)
            sl = slice(h * d_k, (h + 1) * d_k)
            qh = qp[:, sl]                                           # (TQ, d_k)
            kh = kp_ref[:, sl]                                       # (S,  d_k)
            vh = vp_ref[:, sl]                                       # (S,  d_k)

            # q @ k^T without a transposed copy: contract last dims (NT matmul).
            scores = lax.dot_general(qh, kh, (((1,), (1,)), ((), ())),
                                     preferred_element_type=jnp.float32)  # (TQ, S)

            # TODO(synk): optional additive attention mask would be applied here.
            m = jnp.max(scores, axis=-1, keepdims=True)
            p = jnp.exp(scores - m)
            l = jnp.sum(p, axis=-1, keepdims=True)
            if exact_recip:
                attn = p / l                      # exact on the float32 path
            else:
                attn = p * pl.reciprocal(l, approx=True)   # EUP slot, bf16 path
            # (attention dropout skipped: eval mode / identity)

            ctx_ref[:, sl] = jnp.dot(attn.astype(cdt), vh,
                                     preferred_element_type=jnp.float32
                                     ).astype(cdt)                   # (TQ, d_k)

        # ---- Fused output projection: one full-width (TQ, D) x (D, D) GEMM. -
        out = (jnp.dot(ctx_ref[...], wo_ref[...],
                       preferred_element_type=jnp.float32) + bo_ref[...])
        o_ref[0] = out.astype(o_ref.dtype)

    return kernel


def _prep_params(params, n_heads, compute_dtype):
    """PyTorch-layout params ([out,in] weights) -> [in,out], scale-folded."""
    d_model = params["wq"].shape[0]
    d_k = d_model // n_heads
    scale = 1.0 / math.sqrt(d_k)

    wq = (params["wq"].T * scale).astype(compute_dtype)   # scale folded in
    wk = params["wk"].T.astype(compute_dtype)
    wv = params["wv"].T.astype(compute_dtype)
    wo = params["wo"].T.astype(compute_dtype)
    bq = (params["bq"] * scale).reshape(1, d_model).astype(jnp.float32)
    bk = params["bk"].reshape(1, d_model).astype(jnp.float32)
    bv = params["bv"].reshape(1, d_model).astype(jnp.float32)
    bo = params["bo"].reshape(1, d_model).astype(jnp.float32)
    return wq, wk, wv, wo, bq, bk, bv, bo


def multi_head_attention(q, k, v, params, *, n_heads,
                         compute_dtype=jnp.bfloat16, q_tile=256,
                         vmem_limit_bytes=None):
    """q, k, v: [B, S, D].  params: PyTorch-layout dict (w*: [out,in], b*: [out])."""
    B, S, D = q.shape
    assert k.shape == q.shape and v.shape == q.shape
    assert k.dtype == q.dtype and v.dtype == q.dtype
    assert D % n_heads == 0, "d_model must be divisible by n_heads"
    d_k = D // n_heads
    TQ = min(S, q_tile)
    assert S % TQ == 0, "seq_len must be a multiple of the query tile"
    n_q_tiles = S // TQ
    out_dtype = q.dtype
    in_dtype = q.dtype

    wq, wk, wv, wo, bq, bk, bv, bo = _prep_params(params, n_heads, compute_dtype)

    if vmem_limit_bytes is None:
        # Resident-set estimate (bytes): double-buffered q/out blocks + weights
        # and biases, single-copy raw-K/V staging + projected K/V + packed ctx
        # scratch, plus f32 temporaries (scores/p + qp/out).  2x headroom,
        # floor at the 32 MiB default.  NOTE(v7x): 64 MiB physical VMEM —
        # pass a smaller q_tile / explicit limit there for large S*D.
        ibytes = jnp.dtype(in_dtype).itemsize
        obytes = jnp.dtype(out_dtype).itemsize
        cbytes = jnp.dtype(compute_dtype).itemsize
        blocks = 2 * (TQ * D * ibytes + TQ * D * obytes)
        consts = 2 * (4 * D * D * cbytes + 4 * D * 4)
        scratch = (2 * S * D * ibytes          # raw K/V staging
                   + 2 * S * D * cbytes        # projected K/V
                   + TQ * D * cbytes)          # packed ctx
        temps = (2 * TQ * S + 2 * TQ * D) * 4
        est = blocks + consts + scratch + temps
        vmem_limit_bytes = int(min(max(2 * est, 32 << 20), 96 << 20))

    kernel = _make_mha_kernel(
        n_heads, d_k,
        exact_recip=(jnp.dtype(compute_dtype) == jnp.dtype(jnp.float32)))

    const_spec_w = pl.BlockSpec((D, D), lambda b, i: (0, 0))
    const_spec_b = pl.BlockSpec((1, D), lambda b, i: (0, 0))
    q_spec = pl.BlockSpec((1, TQ, D), lambda b, i: (b, i, 0))

    grid_spec = pltpu.PrefetchScalarGridSpec(
        num_scalar_prefetch=0,
        grid=(B, n_q_tiles),
        in_specs=[q_spec,
                  pl.BlockSpec(memory_space=pl.ANY),     # K stays in HBM
                  pl.BlockSpec(memory_space=pl.ANY),     # V stays in HBM
                  const_spec_w, const_spec_w, const_spec_w, const_spec_w,
                  const_spec_b, const_spec_b, const_spec_b, const_spec_b],
        out_specs=q_spec,
        scratch_shapes=[pltpu.VMEM((S, D), in_dtype),       # raw K staging
                        pltpu.VMEM((S, D), in_dtype),       # raw V staging
                        pltpu.VMEM((S, D), compute_dtype),  # projected K
                        pltpu.VMEM((S, D), compute_dtype),  # projected V
                        pltpu.VMEM((TQ, D), compute_dtype), # packed contexts
                        pltpu.SemaphoreType.DMA((2,))])

    return pl.pallas_call(
        kernel,
        out_shape=jax.ShapeDtypeStruct((B, S, D), out_dtype),
        grid_spec=grid_spec,
        compiler_params=pltpu.CompilerParams(
            dimension_semantics=("parallel", "arbitrary"),
            vmem_limit_bytes=vmem_limit_bytes),
    )(q, k, v, wq, wk, wv, wo, bq, bk, bv, bo)


def reference_mha(q, k, v, params, *, n_heads):
    """Pure-JAX float32 reference mirroring the PyTorch forward (eval mode)."""
    B, S, D = q.shape
    d_k = D // n_heads
    scale = 1.0 / math.sqrt(d_k)

    def lin(x, w, b):
        return x @ w.T + b

    qp = lin(q, params["wq"], params["bq"]).reshape(B, S, n_heads, d_k).transpose(0, 2, 1, 3)
    kp = lin(k, params["wk"], params["bk"]).reshape(B, S, n_heads, d_k).transpose(0, 2, 1, 3)
    vp = lin(v, params["wv"], params["bv"]).reshape(B, S, n_heads, d_k).transpose(0, 2, 1, 3)
    scores = jnp.einsum("bhqd,bhkd->bhqk", qp, kp) * scale
    attn = jax.nn.softmax(scores, axis=-1)
    out = jnp.einsum("bhqk,bhkd->bhqd", attn, vp)
    out = out.transpose(0, 2, 1, 3).reshape(B, S, D)
    return lin(out, params["wo"], params["bo"])


def init_params(key, d_model):
    """Deterministic PyTorch-nn.Linear-style uniform init ([out,in] weights)."""
    bound = 1.0 / math.sqrt(d_model)
    keys = jax.random.split(key, 8)
    names = ["wq", "bq", "wk", "bk", "wv", "bv", "wo", "bo"]
    params = {}
    for i, name in enumerate(names):
        shape = (d_model, d_model) if name.startswith("w") else (d_model,)
        params[name] = jax.random.uniform(
            keys[i], shape, jnp.float32, minval=-bound, maxval=bound)
    return params


if __name__ == "__main__":
    # Small but layout-friendly config: lane dim (d_model) = 128, d_k = 32.
    B, S, D, H = 2, 16, 128, 4

    key = jax.random.PRNGKey(0)
    kq, kk, kv, kpar = jax.random.split(key, 4)
    q = jax.random.normal(kq, (B, S, D), jnp.float32)
    k = jax.random.normal(kk, (B, S, D), jnp.float32)
    v = jax.random.normal(kv, (B, S, D), jnp.float32)
    params = init_params(kpar, D)

    ref = reference_mha(q, k, v, params, n_heads=H)

    # Float32 compute path (exact reciprocal): tight check vs f32 reference.
    out_f32 = jax.block_until_ready(
        multi_head_attention(q, k, v, params, n_heads=H,
                             compute_dtype=jnp.float32))
    assert out_f32.shape == (B, S, D)
    assert jnp.allclose(out_f32, ref, atol=5e-3, rtol=5e-3), \
        f"f32 max err {jnp.max(jnp.abs(out_f32 - ref))}"

    # Default bf16-operand / f32-accumulate path.
    out_bf16 = jax.block_until_ready(
        multi_head_attention(q, k, v, params, n_heads=H))
    assert out_bf16.shape == (B, S, D)
    assert jnp.allclose(out_bf16, ref, atol=6e-2, rtol=6e-2), \
        f"bf16 max err {jnp.max(jnp.abs(out_bf16 - ref))}"

    print("KERNEL_OK")
</pallas_src>

<mosaic_0001>
module attributes {stable_mosaic.version = 11 : i64} {
  func.func @kernel(%arg0: i32, %arg1: i32, %arg2: memref<1x16x128xf32, #tpu.memory_space<vmem>>, %arg3: memref<2x16x128xf32, #tpu.memory_space<any>>, %arg4: memref<2x16x128xf32, #tpu.memory_space<any>>, %arg5: memref<128x128xf32, #tpu.memory_space<vmem>>, %arg6: memref<128x128xf32, #tpu.memory_space<vmem>>, %arg7: memref<128x128xf32, #tpu.memory_space<vmem>>, %arg8: memref<128x128xf32, #tpu.memory_space<vmem>>, %arg9: memref<1x128xf32, #tpu.memory_space<vmem>>, %arg10: memref<1x128xf32, #tpu.memory_space<vmem>>, %arg11: memref<1x128xf32, #tpu.memory_space<vmem>>, %arg12: memref<1x128xf32, #tpu.memory_space<vmem>>, %arg13: memref<1x16x128xf32, #tpu.memory_space<vmem>>, %arg14: memref<16x128xf32, #tpu.memory_space<vmem>>, %arg15: memref<16x128xf32, #tpu.memory_space<vmem>>, %arg16: memref<16x128xf32, #tpu.memory_space<vmem>>, %arg17: memref<16x128xf32, #tpu.memory_space<vmem>>, %arg18: memref<16x128xf32, #tpu.memory_space<vmem>>, %arg19: memref<2x!tpu.dma_semaphore, #tpu.memory_space<semaphore_mem>>) attributes {dimension_semantics = [#tpu.dimension_semantics<parallel>, #tpu.dimension_semantics<arbitrary>], iteration_bounds = array<i64: 2, 1>, scalar_prefetch = 0 : i64, scratch_operands = 6 : i64, tpu.core_type = #tpu.core_type<tc>, window_params = [{transform_indices = @transform_0, window_bounds = array<i64: 1, 16, 128>}, {}, {}, {pipeline_mode = #tpu.pipeline_mode<synchronous>, transform_indices = @transform_3, window_bounds = array<i64: 128, 128>}, {pipeline_mode = #tpu.pipeline_mode<synchronous>, transform_indices = @transform_4, window_bounds = array<i64: 128, 128>}, {pipeline_mode = #tpu.pipeline_mode<synchronous>, transform_indices = @transform_5, window_bounds = array<i64: 128, 128>}, {pipeline_mode = #tpu.pipeline_mode<synchronous>, transform_indices = @transform_6, window_bounds = array<i64: 128, 128>}, {pipeline_mode = #tpu.pipeline_mode<synchronous>, transform_indices = @transform_7, window_bounds = array<i64: 1, 128>}, {pipeline_mode = #tpu.pipeline_mode<synchronous>, transform_indices = @transform_8, window_bounds = array<i64: 1, 128>}, {pipeline_mode = #tpu.pipeline_mode<synchronous>, transform_indices = @transform_9, window_bounds = array<i64: 1, 128>}, {pipeline_mode = #tpu.pipeline_mode<synchronous>, transform_indices = @transform_10, window_bounds = array<i64: 1, 128>}, {transform_indices = @transform_11, window_bounds = array<i64: 1, 16, 128>}]} {
    %c0_i32 = arith.constant 0 : i32
    %0 = arith.cmpi eq, %arg1, %c0_i32 : i32
    %1 = arith.extui %0 : i1 to i32
    %c0_i32_0 = arith.constant 0 : i32
    %2 = arith.cmpi ne, %1, %c0_i32_0 : i32
    scf.if %2 {
      %c0_i32_54 = arith.constant 0 : i32
      %c0_i32_55 = arith.constant 0 : i32
      %c0_i32_56 = arith.constant 0 : i32
      %79 = tpu.memref_slice %arg3[%arg0, %c0_i32_55, %c0_i32_56] : memref<2x16x128xf32, #tpu.memory_space<any>> -> memref<1x16x128xf32, #tpu.memory_space<any>>
      %80 = tpu.memref_squeeze %79 : memref<1x16x128xf32, #tpu.memory_space<any>> -> memref<16x128xf32, #tpu.memory_space<any>>
      %81 = tpu.memref_slice %arg19[%c0_i32_54] : memref<2x!tpu.dma_semaphore, #tpu.memory_space<semaphore_mem>> -> memref<1x!tpu.dma_semaphore, #tpu.memory_space<semaphore_mem>>
      %82 = tpu.memref_squeeze %81 : memref<1x!tpu.dma_semaphore, #tpu.memory_space<semaphore_mem>> -> memref<!tpu.dma_semaphore, #tpu.memory_space<semaphore_mem>>
      tpu.enqueue_dma source(%80 : memref<16x128xf32, #tpu.memory_space<any>>) target(%arg14 : memref<16x128xf32, #tpu.memory_space<vmem>>) target_semaphore(%82 : memref<!tpu.dma_semaphore, #tpu.memory_space<semaphore_mem>>)
      %c1_i32 = arith.constant 1 : i32
      %c0_i32_57 = arith.constant 0 : i32
      %c0_i32_58 = arith.constant 0 : i32
      %83 = tpu.memref_slice %arg4[%arg0, %c0_i32_57, %c0_i32_58] : memref<2x16x128xf32, #tpu.memory_space<any>> -> memref<1x16x128xf32, #tpu.memory_space<any>>
      %84 = tpu.memref_squeeze %83 : memref<1x16x128xf32, #tpu.memory_space<any>> -> memref<16x128xf32, #tpu.memory_space<any>>
      %85 = tpu.memref_slice %arg19[%c1_i32] : memref<2x!tpu.dma_semaphore, #tpu.memory_space<semaphore_mem>> -> memref<1x!tpu.dma_semaphore, #tpu.memory_space<semaphore_mem>>
      %86 = tpu.memref_squeeze %85 : memref<1x!tpu.dma_semaphore, #tpu.memory_space<semaphore_mem>> -> memref<!tpu.dma_semaphore, #tpu.memory_space<semaphore_mem>>
      tpu.enqueue_dma source(%84 : memref<16x128xf32, #tpu.memory_space<any>>) target(%arg15 : memref<16x128xf32, #tpu.memory_space<vmem>>) target_semaphore(%86 : memref<!tpu.dma_semaphore, #tpu.memory_space<semaphore_mem>>)
      %c0_i32_59 = arith.constant 0 : i32
      %c0_i32_60 = arith.constant 0 : i32
      %c0_i32_61 = arith.constant 0 : i32
      %87 = tpu.memref_slice %arg3[%arg0, %c0_i32_60, %c0_i32_61] : memref<2x16x128xf32, #tpu.memory_space<any>> -> memref<1x16x128xf32, #tpu.memory_space<any>>
      %88 = tpu.memref_squeeze %87 : memref<1x16x128xf32, #tpu.memory_space<any>> -> memref<16x128xf32, #tpu.memory_space<any>>
      %89 = tpu.memref_slice %arg19[%c0_i32_59] : memref<2x!tpu.dma_semaphore, #tpu.memory_space<semaphore_mem>> -> memref<1x!tpu.dma_semaphore, #tpu.memory_space<semaphore_mem>>
      %90 = tpu.memref_squeeze %89 : memref<1x!tpu.dma_semaphore, #tpu.memory_space<semaphore_mem>> -> memref<!tpu.dma_semaphore, #tpu.memory_space<semaphore_mem>>
      tpu.wait_dma2 semaphore(%90 : memref<!tpu.dma_semaphore, #tpu.memory_space<semaphore_mem>>) src(%88 : memref<16x128xf32, #tpu.memory_space<any>>) dst(%arg14 : memref<16x128xf32, #tpu.memory_space<vmem>>)
      %c0_62 = arith.constant 0 : index
      %c0_63 = arith.constant 0 : index
      %91 = vector.load %arg14[%c0_62, %c0_63] : memref<16x128xf32, #tpu.memory_space<vmem>>, vector<16x128xf32>
      %c0_64 = arith.constant 0 : index
      %c0_65 = arith.constant 0 : index
      %92 = vector.load %arg6[%c0_64, %c0_65] : memref<128x128xf32, #tpu.memory_space<vmem>>, vector<128x128xf32>
      %cst_66 = arith.constant dense<0.000000e+00> : vector<16x128xf32>
      %93 = tpu.matmul %91, %92, %cst_66 {dimension_numbers = #tpu.dot_dimension_numbers<[1], [0], [0], [1], [0, 0, 1, 1], [], []>} : vector<16x128xf32>, vector<128x128xf32>, vector<16x128xf32> -> vector<16x128xf32>
      %c0_67 = arith.constant 0 : index
      %c0_68 = arith.constant 0 : index
      %94 = vector.load %arg10[%c0_67, %c0_68] : memref<1x128xf32, #tpu.memory_space<vmem>>, vector<1x128xf32>
      %95 = vector.broadcast %94 : vector<1x128xf32> to vector<16x128xf32>
      %96 = arith.addf %93, %95 : vector<16x128xf32>
      %c0_69 = arith.constant 0 : index
      %c0_70 = arith.constant 0 : index
      %97 = vector.load %arg16[%c0_69, %c0_70] : memref<16x128xf32, #tpu.memory_space<vmem>>, vector<16x128xf32>
      tpu.vector_store %arg16[%c0_69, %c0_70], %96 {strides = array<i32>} : memref<16x128xf32, #tpu.memory_space<vmem>>, vector<16x128xf32>,
      %c1_i32_71 = arith.constant 1 : i32
      %c0_i32_72 = arith.constant 0 : i32
      %c0_i32_73 = arith.constant 0 : i32
      %98 = tpu.memref_slice %arg4[%arg0, %c0_i32_72, %c0_i32_73] : memref<2x16x128xf32, #tpu.memory_space<any>> -> memref<1x16x128xf32, #tpu.memory_space<any>>
      %99 = tpu.memref_squeeze %98 : memref<1x16x128xf32, #tpu.memory_space<any>> -> memref<16x128xf32, #tpu.memory_space<any>>
      %100 = tpu.memref_slice %arg19[%c1_i32_71] : memref<2x!tpu.dma_semaphore, #tpu.memory_space<semaphore_mem>> -> memref<1x!tpu.dma_semaphore, #tpu.memory_space<semaphore_mem>>
      %101 = tpu.memref_squeeze %100 : memref<1x!tpu.dma_semaphore, #tpu.memory_space<semaphore_mem>> -> memref<!tpu.dma_semaphore, #tpu.memory_space<semaphore_mem>>
      tpu.wait_dma2 semaphore(%101 : memref<!tpu.dma_semaphore, #tpu.memory_space<semaphore_mem>>) src(%99 : memref<16x128xf32, #tpu.memory_space<any>>) dst(%arg15 : memref<16x128xf32, #tpu.memory_space<vmem>>)
      %c0_74 = arith.constant 0 : index
      %c0_75 = arith.constant 0 : index
      %102 = vector.load %arg15[%c0_74, %c0_75] : memref<16x128xf32, #tpu.memory_space<vmem>>, vector<16x128xf32>
      %c0_76 = arith.constant 0 : index
      %c0_77 = arith.constant 0 : index
      %103 = vector.load %arg7[%c0_76, %c0_77] : memref<128x128xf32, #tpu.memory_space<vmem>>, vector<128x128xf32>
      %cst_78 = arith.constant dense<0.000000e+00> : vector<16x128xf32>
      %104 = tpu.matmul %102, %103, %cst_78 {dimension_numbers = #tpu.dot_dimension_numbers<[1], [0], [0], [1], [0, 0, 1, 1], [], []>} : vector<16x128xf32>, vector<128x128xf32>, vector<16x128xf32> -> vector<16x128xf32>
      %c0_79 = arith.constant 0 : index
      %c0_80 = arith.constant 0 : index
      %105 = vector.load %arg11[%c0_79, %c0_80] : memref<1x128xf32, #tpu.memory_space<vmem>>, vector<1x128xf32>
      %106 = vector.broadcast %105 : vector<1x128xf32> to vector<16x128xf32>
      %107 = arith.addf %104, %106 : vector<16x128xf32>
      %c0_81 = arith.constant 0 : index
      %c0_82 = arith.constant 0 : index
      %108 = vector.load %arg17[%c0_81, %c0_82] : memref<16x128xf32, #tpu.memory_space<vmem>>, vector<16x128xf32>
      tpu.vector_store %arg17[%c0_81, %c0_82], %107 {strides = array<i32>} : memref<16x128xf32, #tpu.memory_space<vmem>>, vector<16x128xf32>,
    } else {
    }
    %c0 = arith.constant 0 : index
    %c0_1 = arith.constant 0 : index
    %c0_2 = arith.constant 0 : index
    %3 = vector.load %arg2[%c0, %c0_1, %c0_2] : memref<1x16x128xf32, #tpu.memory_space<vmem>>, vector<1x16x128xf32>
    %4 = vector.shape_cast %3 : vector<1x16x128xf32> to vector<16x128xf32>
    %c0_3 = arith.constant 0 : index
    %c0_4 = arith.constant 0 : index
    %5 = vector.load %arg5[%c0_3, %c0_4] : memref<128x128xf32, #tpu.memory_space<vmem>>, vector<128x128xf32>
    %cst = arith.constant dense<0.000000e+00> : vector<16x128xf32>
    %6 = tpu.matmul %4, %5, %cst {dimension_numbers = #tpu.dot_dimension_numbers<[1], [0], [0], [1], [0, 0, 1, 1], [], []>} : vector<16x128xf32>, vector<128x128xf32>, vector<16x128xf32> -> vector<16x128xf32>
    %c0_5 = arith.constant 0 : index
    %c0_6 = arith.constant 0 : index
    %7 = vector.load %arg9[%c0_5, %c0_6] : memref<1x128xf32, #tpu.memory_space<vmem>>, vector<1x128xf32>
    %8 = vector.broadcast %7 : vector<1x128xf32> to vector<16x128xf32>
    %9 = arith.addf %6, %8 : vector<16x128xf32>
    %10 = vector.extract_strided_slice %9 {offsets = [0, 0], sizes = [16, 32], strides = [1, 1]} : vector<16x128xf32> to vector<16x32xf32>
    %c0_7 = arith.constant 0 : index
    %c0_8 = arith.constant 0 : index
    %11 = vector.load %arg16[%c0_7, %c0_8] : memref<16x128xf32, #tpu.memory_space<vmem>>, vector<16x32xf32>
    %c0_9 = arith.constant 0 : index
    %c0_10 = arith.constant 0 : index
    %12 = vector.load %arg17[%c0_9, %c0_10] : memref<16x128xf32, #tpu.memory_space<vmem>>, vector<16x32xf32>
    %cst_11 = arith.constant dense<0.000000e+00> : vector<16x16xf32>
    %13 = tpu.matmul %10, %11, %cst_11 {dimension_numbers = #tpu.dot_dimension_numbers<[1], [1], [0], [0], [0, 0, 1, 0], [], []>} : vector<16x32xf32>, vector<16x32xf32>, vector<16x16xf32> -> vector<16x16xf32>
    %cst_12 = arith.constant dense<0xFF800000> : vector<16xf32>
    %14 = vector.multi_reduction <maximumf>, %13, %cst_12 [1] : vector<16x16xf32> to vector<16xf32>
    %15 = vector.shape_cast %14 : vector<16xf32> to vector<16x1xf32>
    %16 = vector.broadcast %15 : vector<16x1xf32> to vector<16x16xf32>
    %17 = arith.subf %13, %16 : vector<16x16xf32>
    %18 = math.exp %17 : vector<16x16xf32>
    %cst_13 = arith.constant dense<0.000000e+00> : vector<16xf32>
    %19 = vector.multi_reduction <add>, %18, %cst_13 [1] : vector<16x16xf32> to vector<16xf32>
    %20 = vector.shape_cast %19 : vector<16xf32> to vector<16x1xf32>
    %21 = vector.broadcast %20 : vector<16x1xf32> to vector<16x16xf32>
    %22 = arith.divf %18, %21 : vector<16x16xf32>
    %cst_14 = arith.constant dense<0.000000e+00> : vector<16x32xf32>
    %23 = tpu.matmul %22, %12, %cst_14 {dimension_numbers = #tpu.dot_dimension_numbers<[1], [0], [0], [1], [0, 0, 1, 1], [], []>} : vector<16x16xf32>, vector<16x32xf32>, vector<16x32xf32> -> vector<16x32xf32>
    %c0_15 = arith.constant 0 : index
    %c0_16 = arith.constant 0 : index
    %24 = vector.load %arg18[%c0_15, %c0_16] : memref<16x128xf32, #tpu.memory_space<vmem>>, vector<16x32xf32>
    tpu.vector_store %arg18[%c0_15, %c0_16], %23 {strides = array<i32>} : memref<16x128xf32, #tpu.memory_space<vmem>>, vector<16x32xf32>,
    %25 = vector.extract_strided_slice %9 {offsets = [0, 32], sizes = [16, 32], strides = [1, 1]} : vector<16x128xf32> to vector<16x32xf32>
    %c0_17 = arith.constant 0 : index
    %c32 = arith.constant 32 : index
    %26 = vector.load %arg16[%c0_17, %c32] : memref<16x128xf32, #tpu.memory_space<vmem>>, vector<16x32xf32>
    %c0_18 = arith.constant 0 : index
    %c32_19 = arith.constant 32 : index
    %27 = vector.load %arg17[%c0_18, %c32_19] : memref<16x128xf32, #tpu.memory_space<vmem>>, vector<16x32xf32>
    %cst_20 = arith.constant dense<0.000000e+00> : vector<16x16xf32>
    %28 = tpu.matmul %25, %26, %cst_20 {dimension_numbers = #tpu.dot_dimension_numbers<[1], [1], [0], [0], [0, 0, 1, 0], [], []>} : vector<16x32xf32>, vector<16x32xf32>, vector<16x16xf32> -> vector<16x16xf32>
    %cst_21 = arith.constant dense<0xFF800000> : vector<16xf32>
    %29 = vector.multi_reduction <maximumf>, %28, %cst_21 [1] : vector<16x16xf32> to vector<16xf32>
    %30 = vector.shape_cast %29 : vector<16xf32> to vector<16x1xf32>
    %31 = vector.broadcast %30 : vector<16x1xf32> to vector<16x16xf32>
    %32 = arith.subf %28, %31 : vector<16x16xf32>
    %33 = math.exp %32 : vector<16x16xf32>
    %cst_22 = arith.constant dense<0.000000e+00> : vector<16xf32>
    %34 = vector.multi_reduction <add>, %33, %cst_22 [1] : vector<16x16xf32> to vector<16xf32>
    %35 = vector.shape_cast %34 : vector<16xf32> to vector<16x1xf32>
    %36 = vector.broadcast %35 : vector<16x1xf32> to vector<16x16xf32>
    %37 = arith.divf %33, %36 : vector<16x16xf32>
    %cst_23 = arith.constant dense<0.000000e+00> : vector<16x32xf32>
    %38 = tpu.matmul %37, %27, %cst_23 {dimension_numbers = #tpu.dot_dimension_numbers<[1], [0], [0], [1], [0, 0, 1, 1], [], []>} : vector<16x16xf32>, vector<16x32xf32>, vector<16x32xf32> -> vector<16x32xf32>
    %c0_24 = arith.constant 0 : index
    %c32_25 = arith.constant 32 : index
    %39 = vector.load %arg18[%c0_24, %c32_25] : memref<16x128xf32, #tpu.memory_space<vmem>>, vector<16x32xf32>
    tpu.vector_store %arg18[%c0_24, %c32_25], %38 {strides = array<i32>} : memref<16x128xf32, #tpu.memory_space<vmem>>, vector<16x32xf32>,
    %40 = vector.extract_strided_slice %9 {offsets = [0, 64], sizes = [16, 32], strides = [1, 1]} : vector<16x128xf32> to vector<16x32xf32>
    %c0_26 = arith.constant 0 : index
    %c64 = arith.constant 64 : index
    %41 = vector.load %arg16[%c0_26, %c64] : memref<16x128xf32, #tpu.memory_space<vmem>>, vector<16x32xf32>
    %c0_27 = arith.constant 0 : index
    %c64_28 = arith.constant 64 : index
    %42 = vector.load %arg17[%c0_27, %c64_28] : memref<16x128xf32, #tpu.memory_space<vmem>>, vector<16x32xf32>
    %cst_29 = arith.constant dense<0.000000e+00> : vector<16x16xf32>
    %43 = tpu.matmul %40, %41, %cst_29 {dimension_numbers = #tpu.dot_dimension_numbers<[1], [1], [0], [0], [0, 0, 1, 0], [], []>} : vector<16x32xf32>, vector<16x32xf32>, vector<16x16xf32> -> vector<16x16xf32>
    %cst_30 = arith.constant dense<0xFF800000> : vector<16xf32>
    %44 = vector.multi_reduction <maximumf>, %43, %cst_30 [1] : vector<16x16xf32> to vector<16xf32>
    %45 = vector.shape_cast %44 : vector<16xf32> to vector<16x1xf32>
    %46 = vector.broadcast %45 : vector<16x1xf32> to vector<16x16xf32>
    %47 = arith.subf %43, %46 : vector<16x16xf32>
    %48 = math.exp %47 : vector<16x16xf32>
    %cst_31 = arith.constant dense<0.000000e+00> : vector<16xf32>
    %49 = vector.multi_reduction <add>, %48, %cst_31 [1] : vector<16x16xf32> to vector<16xf32>
    %50 = vector.shape_cast %49 : vector<16xf32> to vector<16x1xf32>
    %51 = vector.broadcast %50 : vector<16x1xf32> to vector<16x16xf32>
    %52 = arith.divf %48, %51 : vector<16x16xf32>
    %cst_32 = arith.constant dense<0.000000e+00> : vector<16x32xf32>
    %53 = tpu.matmul %52, %42, %cst_32 {dimension_numbers = #tpu.dot_dimension_numbers<[1], [0], [0], [1], [0, 0, 1, 1], [], []>} : vector<16x16xf32>, vector<16x32xf32>, vector<16x32xf32> -> vector<16x32xf32>
    %c0_33 = arith.constant 0 : index
    %c64_34 = arith.constant 64 : index
    %54 = vector.load %arg18[%c0_33, %c64_34] : memref<16x128xf32, #tpu.memory_space<vmem>>, vector<16x32xf32>
    tpu.vector_store %arg18[%c0_33, %c64_34], %53 {strides = array<i32>} : memref<16x128xf32, #tpu.memory_space<vmem>>, vector<16x32xf32>,
    %55 = vector.extract_strided_slice %9 {offsets = [0, 96], sizes = [16, 32], strides = [1, 1]} : vector<16x128xf32> to vector<16x32xf32>
    %c0_35 = arith.constant 0 : index
    %c96 = arith.constant 96 : index
    %56 = vector.load %arg16[%c0_35, %c96] : memref<16x128xf32, #tpu.memory_space<vmem>>, vector<16x32xf32>
    %c0_36 = arith.constant 0 : index
    %c96_37 = arith.constant 96 : index
    %57 = vector.load %arg17[%c0_36, %c96_37] : memref<16x128xf32, #tpu.memory_space<vmem>>, vector<16x32xf32>
    %cst_38 = arith.constant dense<0.000000e+00> : vector<16x16xf32>
    %58 = tpu.matmul %55, %56, %cst_38 {dimension_numbers = #tpu.dot_dimension_numbers<[1], [1], [0], [0], [0, 0, 1, 0], [], []>} : vector<16x32xf32>, vector<16x32xf32>, vector<16x16xf32> -> vector<16x16xf32>
    %cst_39 = arith.constant dense<0xFF800000> : vector<16xf32>
    %59 = vector.multi_reduction <maximumf>, %58, %cst_39 [1] : vector<16x16xf32> to vector<16xf32>
    %60 = vector.shape_cast %59 : vector<16xf32> to vector<16x1xf32>
    %61 = vector.broadcast %60 : vector<16x1xf32> to vector<16x16xf32>
    %62 = arith.subf %58, %61 : vector<16x16xf32>
    %63 = math.exp %62 : vector<16x16xf32>
    %cst_40 = arith.constant dense<0.000000e+00> : vector<16xf32>
    %64 = vector.multi_reduction <add>, %63, %cst_40 [1] : vector<16x16xf32> to vector<16xf32>
    %65 = vector.shape_cast %64 : vector<16xf32> to vector<16x1xf32>
    %66 = vector.broadcast %65 : vector<16x1xf32> to vector<16x16xf32>
    %67 = arith.divf %63, %66 : vector<16x16xf32>
    %cst_41 = arith.constant dense<0.000000e+00> : vector<16x32xf32>
    %68 = tpu.matmul %67, %57, %cst_41 {dimension_numbers = #tpu.dot_dimension_numbers<[1], [0], [0], [1], [0, 0, 1, 1], [], []>} : vector<16x16xf32>, vector<16x32xf32>, vector<16x32xf32> -> vector<16x32xf32>
    %c0_42 = arith.constant 0 : index
    %c96_43 = arith.constant 96 : index
    %69 = vector.load %arg18[%c0_42, %c96_43] : memref<16x128xf32, #tpu.memory_space<vmem>>, vector<16x32xf32>
    tpu.vector_store %arg18[%c0_42, %c96_43], %68 {strides = array<i32>} : memref<16x128xf32, #tpu.memory_space<vmem>>, vector<16x32xf32>,
    %c0_44 = arith.constant 0 : index
    %c0_45 = arith.constant 0 : index
    %70 = vector.load %arg18[%c0_44, %c0_45] : memref<16x128xf32, #tpu.memory_space<vmem>>, vector<16x128xf32>
    %c0_46 = arith.constant 0 : index
    %c0_47 = arith.constant 0 : index
    %71 = vector.load %arg8[%c0_46, %c0_47] : memref<128x128xf32, #tpu.memory_space<vmem>>, vector<128x128xf32>
    %cst_48 = arith.constant dense<0.000000e+00> : vector<16x128xf32>
    %72 = tpu.matmul %70, %71, %cst_48 {dimension_numbers = #tpu.dot_dimension_numbers<[1], [0], [0], [1], [0, 0, 1, 1], [], []>} : vector<16x128xf32>, vector<128x128xf32>, vector<16x128xf32> -> vector<16x128xf32>
    %c0_49 = arith.constant 0 : index
    %c0_50 = arith.constant 0 : index
    %73 = vector.load %arg12[%c0_49, %c0_50] : memref<1x128xf32, #tpu.memory_space<vmem>>, vector<1x128xf32>
    %74 = vector.broadcast %73 : vector<1x128xf32> to vector<16x128xf32>
    %75 = arith.addf %72, %74 : vector<16x128xf32>
    %c0_51 = arith.constant 0 : index
    %c0_52 = arith.constant 0 : index
    %c0_53 = arith.constant 0 : index
    %76 = vector.load %arg13[%c0_51, %c0_52, %c0_53] : memref<1x16x128xf32, #tpu.memory_space<vmem>>, vector<1x16x128xf32>
    %77 = vector.shape_cast %76 : vector<1x16x128xf32> to vector<16x128xf32>
    %78 = vector.shape_cast %75 : vector<16x128xf32> to vector<1x16x128xf32>
    tpu.vector_store %arg13[%c0_51, %c0_52, %c0_53], %78 {strides = array<i32>} : memref<1x16x128xf32, #tpu.memory_space<vmem>>, vector<1x16x128xf32>,
    return
  }
  func.func @transform_0(%arg0: i32, %arg1: i32) -> (i32, i32, i32) {
    %c0_i32 = arith.constant 0 : i32
    %c0_i32_0 = arith.constant 0 : i32
    return %arg0, %arg1, %c0_i32 : i32, i32, i32
  }
  func.func @transform_3(%arg0: i32, %arg1: i32) -> (i32, i32) {
    %c0_i32 = arith.constant 0 : i32
    %c0_i32_0 = arith.constant 0 : i32
    %c0_i32_1 = arith.constant 0 : i32
    return %c0_i32, %c0_i32_0 : i32, i32
  }
  func.func @transform_4(%arg0: i32, %arg1: i32) -> (i32, i32) {
    %c0_i32 = arith.constant 0 : i32
    %c0_i32_0 = arith.constant 0 : i32
    %c0_i32_1 = arith.constant 0 : i32
    return %c0_i32, %c0_i32_0 : i32, i32
  }
  func.func @transform_5(%arg0: i32, %arg1: i32) -> (i32, i32) {
    %c0_i32 = arith.constant 0 : i32
    %c0_i32_0 = arith.constant 0 : i32
    %c0_i32_1 = arith.constant 0 : i32
    return %c0_i32, %c0_i32_0 : i32, i32
  }
  func.func @transform_6(%arg0: i32, %arg1: i32) -> (i32, i32) {
    %c0_i32 = arith.constant 0 : i32
    %c0_i32_0 = arith.constant 0 : i32
    %c0_i32_1 = arith.constant 0 : i32
    return %c0_i32, %c0_i32_0 : i32, i32
  }
  func.func @transform_7(%arg0: i32, %arg1: i32) -> (i32, i32) {
    %c0_i32 = arith.constant 0 : i32
    %c0_i32_0 = arith.constant 0 : i32
    %c0_i32_1 = arith.constant 0 : i32
    return %c0_i32, %c0_i32_0 : i32, i32
  }
  func.func @transform_8(%arg0: i32, %arg1: i32) -> (i32, i32) {
    %c0_i32 = arith.constant 0 : i32
    %c0_i32_0 = arith.constant 0 : i32
    %c0_i32_1 = arith.constant 0 : i32
    return %c0_i32, %c0_i32_0 : i32, i32
  }
  func.func @transform_9(%arg0: i32, %arg1: i32) -> (i32, i32) {
    %c0_i32 = arith.constant 0 : i32
    %c0_i32_0 = arith.constant 0 : i32
    %c0_i32_1 = arith.constant 0 : i32
    return %c0_i32, %c0_i32_0 : i32, i32
  }
  func.func @transform_10(%arg0: i32, %arg1: i32) -> (i32, i32) {
    %c0_i32 = arith.constant 0 : i32
    %c0_i32_0 = arith.constant 0 : i32
    %c0_i32_1 = arith.constant 0 : i32
    return %c0_i32, %c0_i32_0 : i32, i32
  }
  func.func @transform_11(%arg0: i32, %arg1: i32) -> (i32, i32, i32) {
    %c0_i32 = arith.constant 0 : i32
    %c0_i32_0 = arith.constant 0 : i32
    return %arg0, %arg1, %c0_i32 : i32, i32, i32
  }
}

</mosaic_0001>

<bundles_post_ra>
// kernel: tpu_custom_call.1
= control target key start
LH: loop header
LB: loop body
LE: loop exit
PB: predicated region body
PF: predicated region fallthrough
CT: control target
= control target key end

     0   :  { %s2323_s0 = inlined_call_operand.hbm [shape: f32[2,16,128], index: 0, kind: input, shape index: {}]   ;;  %s2324_s1 = inlined_call_operand.hbm [shape: f32[2,16,128], index: 1, kind: input, shape index: {}]   ;;  %s2325_s2 = inlined_call_operand.hbm [shape: f32[2,16,128], index: 2, kind: input, shape index: {}]   ;;  %s2326_s3 = inlined_call_operand.hbm [shape: f32[128,128], index: 3, kind: input, shape index: {}]   ;;  %s2327_s4 = inlined_call_operand.hbm [shape: f32[128,128], index: 4, kind: input, shape index: {}]   ;;  %s2328_s5 = inlined_call_operand.hbm [shape: f32[128,128], index: 5, kind: input, shape index: {}]   ;;  %s2329_s6 = inlined_call_operand.hbm [shape: f32[128,128], index: 6, kind: input, shape index: {}]   ;;  %s2330_s7 = inlined_call_operand.vmem [shape: f32[1,128], index: 7, kind: input, shape index: {}]   ;;  %s2331_s8 = inlined_call_operand.vmem [shape: f32[1,128], index: 8, kind: input, shape index: {}]   ;;  %s2332_s9 = inlined_call_operand.vmem [shape: f32[1,128], index: 9, kind: input, shape index: {}]   ;;  %s2333_s10 = inlined_call_operand.vmem [shape: f32[1,128], index: 10, kind: input, shape index: {}]   ;;  %s2334_s11 = inlined_call_operand.hbm [shape: f32[2,16,128], index: 11, kind: output, shape index: {}]  }
   0x1   :  { %2343 = sst [smem:[#allocation33_spill]] %s2326_s3 }
   0x2   :  { %2344 = sst [smem:[#allocation34_spill]] %s2327_s4 }
   0x3   :  { %2345 = sst [smem:[#allocation35_spill]] %s2328_s5 }
   0x4   :  { %2346 = sst [smem:[#allocation36_spill]] %s2329_s6 }
   0x5   :  { %2347 = sst [smem:[#allocation37_spill]] %s2334_s11 }
   0x6   :  { %16 = vsyncpa [#allocation9], 0 }
   0x7   :  { %18 = vsyncpa [#allocation9 + $0x1], 0 }
   0x8   :  { %19 = vsyncpa [#allocation12], 0 }
   0x9   :  { %20 = vsyncpa [#allocation15], 0 }
   0xa   :  { %21 = vsyncpa [#allocation10], 0 }
   0xb   :  { %23 = vsyncpa [#allocation10 + $0x1], 0  ;;  %s1951_s17 = smov 0   ;;  %s1953_s18 = smov 0  }
   0xc   :  { %s1955_s19 = smov 0   ;;  %s1957_s20 = smov 0  }
   0xd   :  { %s1959_s21 = smov 0   ;;  %s1961_s22 = smov 0  }
   0xe LB: > { %2348 = sst [smem:[#allocation30_spill]] %s1856_s17  ;;  %s2335_s23 = sadd.s32 4294967295, %s1876_s22   ;;  %s1876_s22 = sphi %s1961_s22, %s29_s22   ;;  %s1872_s21 = sphi %s1959_s21, %s2375_s21   ;;  %s1868_s20 = sphi %s1957_s20, %s2374_s20   ;;  %s1864_s19 = sphi %s1955_s19, %s2373_s19   ;;  %s1860_s18 = sphi %s1953_s18, %s2372_s18   ;;  %s1856_s17 = sphi %s1951_s17, %s2371_s17  }
   0xf   : > { %s1370_s24 = sadd.s32 4294967294, %s1876_s22   ;;  %p63_p0 = scmp.ne.s32.totalorder %s1860_s18, %s1856_s17 }
  0x10   : > { %p1987_p1 = scmp.eq.s32.totalorder %s2335_s23, 0  ;;  %p263_p2 = scmp.eq.s32.totalorder %s1370_s24, 1 }
  0x11   : > { %p1371_p4 = scmp.ge.s32.totalorder %s1876_s22, 1  ;;  %p270_p6 = scmp.lt.s32.totalorder %s1876_s22, 3 }
  0x12   : > { %p1993_p3 = por %p1987_p1, %p63_p0  ;;  %p1998_p5 = por %p263_p2, %p63_p0 }
  0x13   : > { %s2353_s3 = sld [smem:[#allocation33_spill]]  ;;  %p2006_p7 = pnand %p1371_p4, %p270_p6 }
  0x14   : > { %s2351_s27 = scalar_select %p1998_p5, 1, 0 }
  0x15   : > { %p1441_p8 = pneg %p2006_p7  ;;  %s1878_s13 = smov [#allocation11]  }
  0x16   : > { %2352 = sst [smem:[#allocation31_spill]] %s2351_s27  ;;  %s283_s14 = sshll.u32 %s1878_s13, 4  ;;  %s284_s14 = int_to_ptr.vmem [resolvable:$true] %s283_s14 }
  0x17   : > { %p2014_p9 = pnand %p1441_p8, %p1987_p1  ;;  %p1376_p10 = scmp.ge.s32.totalorder %s1876_s22, 2 }
  0x18   : > { %s2356_s5 = sld [smem:[#allocation35_spill]]  ;;  %s2339_s29 = smov 128  }
  0x19   : > { %s281_s30 = sshll.u32 %s2353_s3, 4  ;;  %s2340_s23 = smov 8   ;;  %s282_s30 = int_to_ptr.hbm [resolvable:$true] %s281_s30 }
  0x1a   : > { %1444 = dma.hbm_to_vmem [thread:$0]  (!%p2014_p9), %s282_s30, 2048, %s284_s14, [#allocation12], %s2339_s29, %s2339_s29, %s2340_s23  }
  0x1b   : > { %s1881_s13 = smov [#allocation14]   ;;  %s2357_s4 = sld [smem:[#allocation34_spill]] }
  0x1c   : > { %s311_s3 = sshll.u32 %s1881_s13, 4  ;;  %s2358_s6 = sld [smem:[#allocation36_spill]]  ;;  %s312_s3 = int_to_ptr.vmem [resolvable:$true] %s311_s3 }
  0x1d   : > { %s1882_s24 = smov [#allocation13]   ;;  %s1883_s17 = smov [#allocation16]  }
  0x1e   : > { %s309_s28 = sshll.u32 %s2356_s5, 4  ;;  %s297_s13 = sshll.u32 %s1882_s24, 4  ;;  %s310_s28 = int_to_ptr.hbm [resolvable:$true] %s309_s28  ;;  %s298_s13 = int_to_ptr.vmem [resolvable:$true] %s297_s13 }
  0x1f   : > { %1450 = dma.hbm_to_vmem [thread:$0]  (!%p2014_p9), %s310_s28, 2048, %s312_s3, [#allocation15], %s2339_s29, %s2339_s29, %s2340_s23  }
  0x20   : > { %s325_s27 = sshll.u32 %s1883_s17, 4  ;;  %s2359_s3 = sadd.s32 4294967295, %s1876_s22   ;;  %s326_s27 = int_to_ptr.vmem [resolvable:$true] %s325_s27 }
  0x21   : > { %s295_s11 = sshll.u32 %s2357_s4, 4  ;;  %p257_p11 = scmp.eq.s32.totalorder %s2359_s3, 1  ;;  %s296_s11 = int_to_ptr.hbm [resolvable:$true] %s295_s11 }
  0x22   : > { %s323_s16 = sshll.u32 %s2358_s6, 4  ;;  %s41_s28 = sadd.s32 1, %s1872_s21  ;;  %s324_s16 = int_to_ptr.hbm [resolvable:$true] %s323_s16 }
  0x23   : > { %1447 = dma.hbm_to_vmem [thread:$0]  (!%p2014_p9), %s296_s11, 2048, %s298_s13, [#allocation12], %s2339_s29, %s2339_s29, %s2340_s23  }
  0x24   : > { %1453 = dma.hbm_to_vmem [thread:$0]  (!%p2014_p9), %s324_s16, 2048, %s326_s27, [#allocation15], %s2339_s29, %s2339_s29, %s2340_s23  }
  0x25   : > { %p43_p12 = scmp.ge.s32.totalorder %s41_s28, 2  ;;  %s50_s30 = sadd.s32 1, %s1864_s19 }
  0x26   : > { %p57_p13 = scmp.ne.s32.totalorder %s1864_s19, %s1860_s18  ;;  %p58_p0 = scmp.eq.s32.totalorder %s1876_s22, 0 }
  0x27   : > { %s2377_s28 = smov (%p43_p12, %s41_s28), 0  ;;  %p1466_p4 = scmp.lt.s32.totalorder %s1876_s22, 2 }
  0x28   : > { %2360 = sst [smem:[#allocation32_spill]] %s2377_s28  ;;  %p2057_p2 = por %p257_p11, %p57_p13 }
  0x29   : > { %s45_s15 = ssub.s32 %s1872_s21, %s2377_s28  ;;  %s351_s14 = sand.u32 1, %s1864_s19  }
  0x2a   : > { %p48_p6 = scmp.eq.s32.totalorder %s45_s15, 0  ;;  %p59_p8 = por %p58_p0, %p57_p13 }
  0x2b   : > { %s1377_s16 = sshll.u32 %s351_s14, 4  ;;  %s1419_s24 = sshll.u32 %s1872_s21, 4 }
  0x2c   : > { %s2067_s13 = scalar_select %p48_p6, %s1864_s19, %s50_s30  }
  0x2d   : > { %s362_s3 = scalar_lea.hbm %s2323_s0, %s1419_s24  ;;  %s355_s23 = scalar_lea.vmem [#allocation8], %s1377_s16 }
  0x2e   : > { %s363_s29 = sshll.u32 %s362_s3, 4  ;;  %s365_s4 = sshll.u32 %s355_s23, 4  ;;  %s364_s29 = int_to_ptr.hbm [resolvable:$true] %s363_s29  ;;  %s366_s4 = int_to_ptr.vmem [resolvable:$true] %s365_s4 }
  0x2f   : > { %p1455_p9 = pnand %p1466_p4, %p59_p8  ;;  %s352_s5 = scalar_lea.sflag [#allocation9], %s351_s14 }
  0x30   : > { %s2362_s6 = smov 8   ;;  %s2363_s28 = smov 128  }
  0x31   : > { %1457 = dma.hbm_to_vmem [thread:$0]  (!%p1455_p9), %s364_s29, 256, %s366_s4, %s352_s5, %s2363_s28, %s2363_s28, %s2362_s6  }
  0x32   : > { %377 = sbr.rel (%p2006_p7) target bundleno = 1646 (0x66e), region = 56  ;;  %s2080_s30 = sand.u32 (!%p2006_p7), 1, %s1860_s18  }
  0x33   : > { %s2342_s23 = sshll.u32 (!%p2006_p7), %s2080_s30, 4  ;;  %s380_s15 = scalar_lea.sflag (!%p2006_p7), [#allocation9], %s2080_s30 }
  0x34   : > { %s2086_s16 = scalar_lea.vmem (!%p2006_p7), [#allocation8], %s2342_s23 }
  0x37   : > { %1835 = dma.done.wait (%p1993_p3), %s380_s15, 256  }
  0x38   : > { %1837 = vsyncadd (%p1993_p3), %s380_s15, 4294967040 }
  0x39   : > { %1839 = dma.done.wait (%p1987_p1), [#allocation12], 4096  }
  0x3a   : > { %1841 = vsyncadd (%p1987_p1), [#allocation12], 4294963200 }
  0x3b   : > { %1843 = dma.done.wait (%p1987_p1), [#allocation15], 4096  }
  0x3c   : > { %1845 = vsyncadd (%p1987_p1), [#allocation15], 4294963200  ;;  %s2101_s4 = sshll.u32 %s1868_s20, 4  ;;  %s1884_s29 = smov [#allocation2]  }
  0x3d   : > { %s446_s26 = scalar_lea.hbm %s2324_s1, %s2101_s4  ;;  %s456_s28 = sshll.u32 %s1884_s29, 4  ;;  %s457_s28 = int_to_ptr.vmem [resolvable:$true] %s456_s28 }
  0x3e   : > { %s454_s12 = sshll.u32 %s446_s26, 4  ;;  %s1738_s27 = scalar_lea.hbm %s2324_s1, 32  ;;  %s455_s12 = int_to_ptr.hbm [resolvable:$true] %s454_s12 }
  0x3f   : > { %s1734_s14 = sshra.s32 %s455_s12, 4  ;;  %s1735_s14 = int_to_ptr.hbm [resolvable:$true] %s1734_s14 }
  0x40   : > { %s1736_s24 = scalar_lea.hbm %s1735_s14, 16  ;;  %p1739_p1 = scmp.lt.s32.totalorder %s1735_s14, %s2324_s1 }
  0x41   : > { %p1737_p3 = scmp.ne.s32.totalorder %s1735_s14, %s1736_s24  ;;  %p1740_p7 = scmp.lt.s32.totalorder %s1738_s27, %s1736_s24 }
  0x43   : > { %p1741_p11 = por %p1740_p7, %p1739_p1 }
  0x45   : > { %p1742_p12 = pnand %p1741_p11, %p1737_p3 }
  0x47   : > { %1745 = shalt.err (!%p1742_p12)  }
  0x48   : > { %459 = dma.hbm_to_vmem [thread:$0]  %s455_s12, 256, %s457_s28, [#allocation7] }
  0x49   : > { %s460_s6 = scalar_lea.hbm %s2325_s2, %s2101_s4  ;;  %s1885_s29 = smov [#allocation3]  }
  0x4a   : > { %s469_s26 = sshll.u32 %s460_s6, 4  ;;  %s471_s23 = sshll.u32 %s1885_s29, 4  ;;  %s470_s26 = int_to_ptr.hbm [resolvable:$true] %s469_s26  ;;  %s472_s23 = int_to_ptr.vmem [resolvable:$true] %s471_s23 }
  0x4b   : > { %s1758_s17 = sshra.s32 %s470_s26, 4  ;;  %s1762_s27 = scalar_lea.hbm %s2325_s2, 32  ;;  %s1759_s17 = int_to_ptr.hbm [resolvable:$true] %s1758_s17 }
  0x4c   : > { %s1760_s25 = scalar_lea.hbm %s1759_s17, 16  ;;  %p1763_p0 = scmp.lt.s32.totalorder %s1759_s17, %s2325_s2 }
  0x4d   : > { %p1761_p13 = scmp.ne.s32.totalorder %s1759_s17, %s1760_s25  ;;  %p1764_p4 = scmp.lt.s32.totalorder %s1762_s27, %s1760_s25 }
  0x4f   : > { %p1765_p6 = por %p1764_p4, %p1763_p0 }
  0x51   : > { %p1766_p8 = pnand %p1765_p6, %p1761_p13 }
  0x53   : > { %1769 = shalt.err (!%p1766_p8)  }
  0x54   : > { %474 = dma.hbm_to_vmem [thread:$0]  %s470_s26, 256, %s472_s23, [#allocation7 + $0x1] }
  0x55   : > { %s2364_s28 = sshll.u32 %s2080_s30, 4 }
  0x56   : > { %s2125_s3 = scalar_lea.vmem [#allocation17], %s2364_s28 }
  0x57   : > { %1846 = dma.done.wait [#allocation7], 256 }
  0x58   : > { %1847 = vsyncadd [#allocation7], 4294967040  ;;  %v495_v0 = vld [vmem:[#allocation13 + $0x78] sm:$0xff]  ;;  %v494_v1 = vld [vmem:[#allocation13 + $0x70] sm:$0xff] }
  0x59   : > { %500 = vmatpush.msra.mxu0 %v495_v0  ;;  %v493_v2 = vld [vmem:[#allocation13 + $0x68] sm:$0xff]  ;;  %v492_v3 = vld [vmem:[#allocation13 + $0x60] sm:$0xff]  ;;  %v491_v4 = vld [vmem:[#allocation13 + $0x58] sm:$0xff] }
  0x5a   : > { %v490_v5 = vld [vmem:[#allocation13 + $0x50] sm:$0xff]  ;;  %v489_v6 = vld [vmem:[#allocation13 + $0x48] sm:$0xff]  ;;  %v488_v7 = vld [vmem:[#allocation13 + $0x40] sm:$0xff] }
  0x5b   : > { %501 = vmatpush.msra.mxu0 %v494_v1  ;;  %v487_v8 = vld [vmem:[#allocation13 + $0x38] sm:$0xff]  ;;  %v486_v9 = vld [vmem:[#allocation13 + $0x30] sm:$0xff]  ;;  %v485_v10 = vld [vmem:[#allocation13 + $0x28] sm:$0xff] }
  0x5c   : > { %v484_v11 = vld [vmem:[#allocation13 + $0x20] sm:$0xff]  ;;  %v483_v12 = vld [vmem:[#allocation13 + $0x18] sm:$0xff]  ;;  %v482_v13 = vld [vmem:[#allocation13 + $0x10] sm:$0xff] }
  0x5d   : > { %502 = vmatpush.msra.mxu0 %v493_v2  ;;  %v481_v14 = vld [vmem:[#allocation13 + $0x8] sm:$0xff]  ;;  %v480_v15 = vld [vmem:[#allocation13] sm:$0xff]  ;;  %v478_v16 = vld [vmem:[#allocation2] sm:$0xff] }
  0x5e   : > { %v479_v17 = vld [vmem:[#allocation2 + $0x8] sm:$0xff]  ;;  %v1533_v18 = vld [vmem:[%s2331_s8] ss:$0 sm:$0xff] }
  0x5f   : > { %503 = vmatpush.msra.mxu0 %v492_v3 }
  0x61   : > { %504 = vmatpush.msra.mxu0 %v491_v4 }
  0x63   : > { %505 = vmatpush.msra.mxu0 %v490_v5 }
  0x65   : > { %506 = vmatpush.msra.mxu0 %v489_v6 }
  0x67   : > { %507 = vmatpush.msra.mxu0 %v488_v7 }
  0x69   : > { %508 = vmatpush.msra.mxu0 %v487_v8 }
  0x6b   : > { %509 = vmatpush.msra.mxu0 %v486_v9 }
  0x6d   : > { %510 = vmatpush.msra.mxu0 %v485_v10 }
  0x6f   : > { %511 = vmatpush.msra.mxu0 %v484_v11 }
  0x71   : > { %512 = vmatpush.msra.mxu0 %v483_v12 }
  0x73   : > { %513 = vmatpush.msra.mxu0 %v482_v13 }
  0x75   : > { %514 = vmatpush.msra.mxu0 %v481_v14 }
  0x77   : > { %515 = vmatpush.msra.mxu0 %v480_v15 }
  0x78   : > { %516 = vmatmul.f32.vlgmr.msra.gmra.mxu0 %v478_v16 }
  0x80   : > { %519 = vmatmul.f32.gmra.mxu0 %v479_v17 }
  0xf5   : > { %v517_v19 = vpop.f32.mrf.mxu0 }
  0xf6   : > { %v518_v20 = vadd.f32 %v1533_v18, %v517_v19 }
  0xfd   : > { %v520_v21 = vpop.f32.mrf.mxu0 }
  0xfe   : > { %v2130_v22 = vadd.f32 %v1533_v18, %v520_v21 }
  0xff   : > { %1848 = dma.done.wait [#allocation7 + $0x1], 256 }
 0x100   : > { %1849 = vsyncadd [#allocation7 + $0x1], 4294967040  ;;  %s1886_s5 = smov 96   ;;  %v591_v23 = vld [vmem:[#allocation11 + $0x78] sm:$0xff]  ;;  %v590_v24 = vld [vmem:[#allocation11 + $0x70] sm:$0xff]  ;;  %vm623_vm0 = vcmask 261120  }
 0x101   : > { %751 = vrot.lane.b32.xlu2 %v2130_v22, %s1886_s5  ;;  %596 = vmatpush.msra.mxu2 %v591_v23  ;;  %v589_v25 = vld [vmem:[#allocation11 + $0x68] sm:$0xff]  ;;  %v588_v26 = vld [vmem:[#allocation11 + $0x60] sm:$0xff]  ;;  %v587_v27 = vld [vmem:[#allocation11 + $0x58] sm:$0xff]  ;;  %s1887_s6 = smov 64   ;;  %vm659_vm1 = vcmask 130048   ;;  %s2367_s12 = sld [smem:[#allocation37_spill]] }
 0x102   : > { %v586_v28 = vld [vmem:[#allocation11 + $0x50] sm:$0xff]  ;;  %1388 = vmatpush.xpose.msk.msra.mxu3 %vm623_vm0, %v2130_v22  ;;  %v585_v29 = vld [vmem:[#allocation11 + $0x48] sm:$0xff]  ;;  %v584_v30 = vld [vmem:[#allocation11 + $0x40] sm:$0xff]  ;;  %s1224_s23 = sshll.u32 %s2125_s3, 4  ;;  %s1225_s23 = int_to_ptr.vmem [resolvable:$true] %s1224_s23 }
 0x103   : > { %597 = vmatpush.msra.mxu2 %v590_v24  ;;  %v583_v31 = vld [vmem:[#allocation11 + $0x38] sm:$0xff]  ;;  %v582_v32 = vld [vmem:[#allocation11 + $0x30] sm:$0xff]  ;;  %v581_v33 = vld [vmem:[#allocation11 + $0x28] sm:$0xff] }
 0x104   : > { %v580_v34 = vld [vmem:[#allocation11 + $0x20] sm:$0xff]  ;;  %v579_v35 = vld [vmem:[#allocation11 + $0x18] sm:$0xff]  ;;  %v578_v36 = vld [vmem:[#allocation11 + $0x10] sm:$0xff] }
 0x105   : > { %598 = vmatpush.msra.mxu2 %v589_v25  ;;  %v577_v37 = vld [vmem:[#allocation11 + $0x8] sm:$0xff]  ;;  %v576_v38 = vld [vmem:[#allocation11] sm:$0xff]  ;;  %v1549_v41 = vld [vmem:[%s2330_s7] ss:$0 sm:$0xff] }
 0x106   : > { %1389 = vmatpush.xpose.msk.msra.mxu3 %vm623_vm0, %v518_v20  ;;  %v574_v39 = vld [vmem:[%s2086_s16] sm:$0xff]  ;;  %v575_v40 = vld [vmem:[%s2086_s16 + $0x8] sm:$0xff]  ;;  %s1888_s16 = smov 32  }
 0x107   : > { %599 = vmatpush.msra.mxu2 %v588_v26  ;;  %v544_v50 = vld [vmem:[#allocation14 + $0x78] sm:$0xff]  ;;  %v543_v51 = vld [vmem:[#allocation14 + $0x70] sm:$0xff]  ;;  %v542_v52 = vld [vmem:[#allocation14 + $0x68] sm:$0xff]  ;;  %s1223_s28 = scalar_lea.hbm %s2367_s12, %s2101_s4  ;;  %s1802_s4 = scalar_lea.hbm %s2367_s12, 32 }
 0x108   : > { %549 = vmatpush.msra.mxu1 %v544_v50  ;;  %v541_v53 = vld [vmem:[#allocation14 + $0x60] sm:$0xff]  ;;  %v540_v54 = vld [vmem:[#allocation14 + $0x58] sm:$0xff]  ;;  %v539_v55 = vld [vmem:[#allocation14 + $0x50] sm:$0xff]  ;;  %s1226_s15 = sshll.u32 %s1223_s28, 4  ;;  %s1227_s15 = int_to_ptr.hbm [resolvable:$true] %s1226_s15 }
 0x109   : > { %749 = vrot.lane.b32.xlu2 %v518_v20, %s1886_s5  ;;  %600 = vmatpush.msra.mxu2 %v587_v27  ;;  %v538_v56 = vld [vmem:[#allocation14 + $0x48] sm:$0xff]  ;;  %v537_v57 = vld [vmem:[#allocation14 + $0x40] sm:$0xff]  ;;  %v536_v58 = vld [vmem:[#allocation14 + $0x38] sm:$0xff] }
 0x10a   : > { %550 = vmatpush.msra.mxu1 %v543_v51  ;;  %v535_v59 = vld [vmem:[#allocation14 + $0x30] sm:$0xff]  ;;  %v534_v60 = vld [vmem:[#allocation14 + $0x28] sm:$0xff]  ;;  %v533_v61 = vld [vmem:[#allocation14 + $0x20] sm:$0xff] }
 0x10b   : > { %601 = vmatpush.msra.mxu2 %v586_v28  ;;  %v532_v62 = vld [vmem:[#allocation14 + $0x18] sm:$0xff]  ;;  %v531_v63 = vld [vmem:[#allocation14 + $0x10] sm:$0xff]  ;;  %v530_v0 = vld [vmem:[#allocation14 + $0x8] sm:$0xff] }
 0x10c   : > { %551 = vmatpush.msra.mxu1 %v542_v52  ;;  %v529_v1 = vld [vmem:[#allocation14] sm:$0xff]  ;;  %v528_v3 = vld [vmem:[#allocation3 + $0x8] sm:$0xff]  ;;  %v1550_v15 = vld [vmem:[%s2332_s9] ss:$0 sm:$0xff] }
 0x10d   : > { %602 = vmatpush.msra.mxu2 %v585_v29  ;;  %v527_v2 = vld [vmem:[#allocation3] sm:$0xff] }
 0x10e   : > { %552 = vmatpush.msra.mxu1 %v541_v53 }
 0x10f   : > { %603 = vmatpush.msra.mxu2 %v584_v30 }
 0x110   : > { %553 = vmatpush.msra.mxu1 %v540_v54 }
 0x111   : > { %604 = vmatpush.msra.mxu2 %v583_v31  ;;  %890 = vrot.lane.b32.xlu2 %v518_v20, %s1887_s6 }
 0x112   : > { %554 = vmatpush.msra.mxu1 %v539_v55 }
 0x113   : > { %605 = vmatpush.msra.mxu2 %v582_v32 }
 0x114   : > { %555 = vmatpush.msra.mxu1 %v538_v56 }
 0x115   : > { %606 = vmatpush.msra.mxu2 %v581_v33 }
 0x116   : > { %556 = vmatpush.msra.mxu1 %v537_v57 }
 0x117   : > { %607 = vmatpush.msra.mxu2 %v580_v34 }
 0x118   : > { %557 = vmatpush.msra.mxu1 %v536_v58 }
 0x119   : > { %608 = vmatpush.msra.mxu2 %v579_v35 }
 0x11a   : > { %558 = vmatpush.msra.mxu1 %v535_v59 }
 0x11b   : > { %609 = vmatpush.msra.mxu2 %v578_v36 }
 0x11c   : > { %559 = vmatpush.msra.mxu1 %v534_v60 }
 0x11d   : > { %610 = vmatpush.msra.mxu2 %v577_v37 }
 0x11e   : > { %560 = vmatpush.msra.mxu1 %v533_v61 }
 0x11f   : > { %611 = vmatpush.msra.mxu2 %v576_v38 }
 0x120   : > { %612 = vmatmul.f32.vlgmr.msra.gmra.mxu2 %v574_v39  ;;  %561 = vmatpush.msra.mxu1 %v532_v62 }
 0x122   : > { %562 = vmatpush.msra.mxu1 %v531_v63 }
 0x124   : > { %563 = vmatpush.msra.mxu1 %v530_v0 }
 0x126   : > { %564 = vmatpush.msra.mxu1 %v529_v1 }
 0x127   : > { %565 = vmatmul.f32.vlgmr.msra.gmra.mxu1 %v527_v2 }
 0x128   : > { %615 = vmatmul.f32.gmra.mxu2 %v575_v40 }
 0x12f   : > { %568 = vmatmul.f32.gmra.mxu1 %v528_v3 }
 0x15b   : > { %v752_v16 = vpop.permute.xlu2 %751 }
 0x163   : > { %v750_v21 = vpop.permute.xlu2 %749 }
 0x1a3   : > { %v613_v42 = vpop.f32.mrf.mxu2 }
 0x1a4   : > { %v2144_v43 = vadd.f32 %v1549_v41, %v613_v42  ;;  %v566_v14 = vpop.f32.mrf.mxu1 }
 0x1a5   : > { %v567_v18 = vadd.f32 %v1550_v15, %v566_v14 }
 0x1a6   : > { %1390 = vmatmul.msk.f32.vlgmr.msra.gmra.mxu3 %vm623_vm0, %v2144_v43 }
 0x1ab   : > { %v616_v44 = vpop.f32.mrf.mxu2 }
 0x1ac   : > { %v617_v45 = vadd.f32 %v1549_v41, %v616_v44  ;;  %v569_v17 = vpop.f32.mrf.mxu1 }
 0x1ad   : > { %v570_v19 = vadd.f32 %v1550_v15, %v569_v17 }
 0x1ae   : > { %745 = vrot.lane.b32.xlu2 %v617_v45, %s1886_s5  ;;  %1391 = vmatmul.msk.f32.gmra.mxu3 %vm623_vm0, %v617_v45 }
 0x1af   : > { %728 = vmatpush.msrb.mxu3 %v570_v19 }
 0x1b1   : > { %729 = vmatpush.msrb.mxu3 %v567_v18 }
 0x1b3   : > { %1394 = vmatpush.xpose.msk.msra.mxu3 %vm623_vm0, %v752_v16 }
 0x1b6   : > { %884 = vrot.lane.b32.xlu2 %v2144_v43, %s1887_s6 }
 0x1b7   : > { %1395 = vmatpush.xpose.msk.msra.mxu3 %vm623_vm0, %v750_v21 }
 0x1be   : > { %1031 = vrot.lane.b32.xlu2 %v518_v20, %s1888_s16  ;;  %v2171_v20 = vpack.i.bf16 %v567_v18, %v570_v19 }
 0x1c6   : > { %1027 = vrot.lane.b32.xlu2 %v617_v45, %s1888_s16 }
 0x229   : > { %v653_v46 = vpop.f32.mrf.mxu3 }
 0x22a   : > { %v660_v47 = vsel %vm659_vm1, %v653_v46, -inf }
 0x22b   : > { %661 = vmax.xlane.f32.xlu0 %v660_v47 }
 0x231   : > { %v656_v48 = vpop.f32.mrf.mxu3 }
 0x232   : > { %v663_v49 = vsel %vm659_vm1, %v656_v48, -inf }
 0x233   : > { %664 = vmax.xlane.f32.xlu0 %v663_v49 }
 0x247   : > { %743 = vrot.lane.b32.xlu0 %v2144_v43, %s1886_s5 }
 0x24f   : > { %1033 = vrot.lane.b32.xlu0 %v2130_v22, %s1888_s16 }
 0x257   : > { %886 = vrot.lane.b32.xlu0 %v617_v45, %s1887_s6 }
 0x29e   : > { %v662_v4 = vpop.xlane.xlu0 %661 }
 0x29f   : > { %v666_v5 = vsub.f32 %v653_v46, %v662_v4 }
 0x2a1   : > { %v668_v6 = vmul.f32 1.442695, %v666_v5 }
 0x2a3   : > { %1552 = vpow2.f32 %v668_v6 }
 0x2a6   : > { %v665_v7 = vpop.xlane.xlu0 %664 }
 0x2a7   : > { %v667_v8 = vsub.f32 %v656_v48, %v665_v7 }
 0x2a9   : > { %v1553_v9 = vpop.eup %1552  ;;  %v670_v10 = vmul.f32 1.442695, %v667_v8 }
 0x2aa   : > { %v672_v11 = vsel %vm659_vm1, %v1553_v9, 0.0 }
 0x2ab   : > { %1554 = vpow2.f32 %v670_v10  ;;  %673 = vadd.xlane.f32.xlu1 %v672_v11 }
 0x2b1   : > { %v1555_v12 = vpop.eup %1554 }
 0x2b2   : > { %v675_v13 = vsel %vm659_vm1, %v1555_v12, 0.0 }
 0x2b3   : > { %676 = vadd.xlane.f32.xlu1 %v675_v13 }
 0x2b9   : > { %v744_v28 = vpop.permute.xlu0 %743 }
 0x2cc   : > { %892 = vrot.lane.b32.xlu1 %v2130_v22, %s1887_s6  ;;  %v891_v22 = vpop.permute.xlu2 %890 }
 0x2d4   : > { %1025 = vrot.lane.b32.xlu1 %v2144_v43, %s1888_s16  ;;  %v746_v24 = vpop.permute.xlu2 %745  ;;  %v1034_v43 = vpop.permute.xlu0 %1033 }
 0x2dc   : > { %v885_v33 = vpop.permute.xlu2 %884  ;;  %v887_v53 = vpop.permute.xlu0 %886 }
 0x2e4   : > { %v1032_v48 = vpop.permute.xlu2 %1031 }
 0x2ec   : > { %v1028_v55 = vpop.permute.xlu2 %1027 }
 0x31e   : > { %v674_v23 = vpop.xlane.xlu1 %673 }
 0x31f   : > { %1556 = vrcp.f32 %v674_v23  ;;  %v689_v30 = vand.u32 2147483648, %v674_v23  ;;  %v687_v32 = vand.u32 2147483647, %v674_v23  ;;  %vm683_vm3 = vweird.f32 %v674_v23 }
 0x321   : > { %v690_v36 = vor.u32 1.1754944e-38, %v689_v30  ;;  %vm688_vm5 = vcmp.eq.f32.partialorder %v687_v32, 8.507059e+37 }
 0x325   : > { %v1557_v25 = vpop.eup %1556 }
 0x326   : > { %v679_v26 = vmul.f32 %v1557_v25, %v674_v23  ;;  %v677_v27 = vpop.xlane.xlu1 %676  ;;  %vm684_vm2 = vweird.f32 %v1557_v25 }
 0x327   : > { %1558 = vrcp.f32 %v677_v27  ;;  %vm685_vm4 = vmor %vm683_vm3, %vm684_vm2  ;;  %v704_v42 = vand.u32 2147483648, %v677_v27  ;;  %v702_v45 = vand.u32 2147483647, %v677_v27  ;;  %vm698_vm7 = vweird.f32 %v677_v27 }
 0x328   : > { %v680_v29 = vsub.f32 1.0, %v679_v26 }
 0x329   : > { %v705_v47 = vor.u32 1.1754944e-38, %v704_v42  ;;  %vm703_vm9 = vcmp.eq.f32.partialorder %v702_v45, 8.507059e+37 }
 0x32a   : > { %v681_v31 = vmul.f32 %v1557_v25, %v680_v29 }
 0x32c   : > { %v682_v34 = vadd.f32 %v1557_v25, %v681_v31 }
 0x32d   : > { %v1559_v35 = vpop.eup %1558 }
 0x32e   : > { %v694_v37 = vmul.f32 %v1559_v35, %v677_v27  ;;  %v686_v38 = vsel %vm685_vm4, %v1557_v25, %v682_v34  ;;  %vm699_vm6 = vweird.f32 %v1559_v35 }
 0x32f   : > { %v691_v39 = vsel %vm688_vm5, %v690_v36, %v686_v38  ;;  %vm700_vm8 = vmor %vm698_vm7, %vm699_vm6 }
 0x330   : > { %v695_v40 = vsub.f32 1.0, %v694_v37  ;;  %v692_v41 = vmul.f32 %v1553_v9, %v691_v39 }
 0x332   : > { %v696_v44 = vmul.f32 %v1559_v35, %v695_v40  ;;  %1392 = vmatmul.msk.f32.vlgmr.msrb.gmra.mxu3 %vm659_vm1, %v692_v41 }
 0x333   : > { %1406 = vmatpush.xpose.msk.msrb.mxu3 %vm623_vm0, %v1034_v43 }
 0x334   : > { %v697_v46 = vadd.f32 %v1559_v35, %v696_v44 }
 0x336   : > { %v701_v49 = vsel %vm700_vm8, %v1559_v35, %v697_v46 }
 0x337   : > { %v706_v50 = vsel %vm703_vm9, %v705_v47, %v701_v49  ;;  %1407 = vmatpush.xpose.msk.msrb.mxu3 %vm623_vm0, %v1032_v48 }
 0x338   : > { %v707_v51 = vmul.f32 %v1555_v12, %v706_v50 }
 0x33a   : > { %1393 = vmatmul.msk.f32.gmra.mxu3 %vm659_vm1, %v707_v51 }
 0x33e   : > { %v893_v52 = vpop.permute.xlu1 %892 }
 0x33f   : > { %1400 = vmatpush.xpose.msk.msrb.mxu2 %vm623_vm0, %v893_v52 }
 0x342   : > { %1396 = vmatmul.msk.f32.vlgmr.msra.gmra.mxu3 %vm623_vm0, %v744_v28 }
 0x343   : > { %1401 = vmatpush.xpose.msk.msrb.mxu2 %vm623_vm0, %v891_v22 }
 0x346   : > { %1402 = vmatmul.msk.f32.vlgmr.msrb.gmra.mxu2 %vm623_vm0, %v885_v33  ;;  %v1026_v54 = vpop.permute.xlu1 %1025 }
 0x34a   : > { %1397 = vmatmul.msk.f32.gmra.mxu3 %vm623_vm0, %v746_v24 }
 0x34e   : > { %1403 = vmatmul.msk.f32.gmra.mxu2 %vm623_vm0, %v887_v53 }
 0x352   : > { %1408 = vmatmul.msk.f32.vlgmr.msrb.gmra.mxu3 %vm623_vm0, %v1026_v54 }
 0x35a   : > { %1409 = vmatmul.msk.f32.gmra.mxu3 %vm623_vm0, %v1028_v55 }
 0x3b5   : > { %v731_v56 = vpop.f32.mrf.mxu3 }
 0x3b6   : > { %737 = vst.msk [vmem:[#allocation6] sm:$0xff] %vm623_vm0, %v731_v56 }
 0x3bd   : > { %v734_v57 = vpop.f32.mrf.mxu3 }
 0x3be   : > { %738 = vst.msk [vmem:[#allocation6 + $0x8] sm:$0xff] %vm623_vm0, %v734_v57 }
 0x3c5   : > { %v778_v58 = vpop.f32.mrf.mxu3 }
 0x3c6   : > { %v784_v59 = vsel %vm659_vm1, %v778_v58, -inf }
 0x3c7   : > { %785 = vmax.xlane.f32.xlu1 %v784_v59 }
 0x3c9   : > { %v919_v60 = vpop.f32.mrf.mxu2 }
 0x3ca   : > { %v925_v61 = vsel %vm659_vm1, %v919_v60, -inf }
 0x3cb   : > { %926 = vmax.xlane.f32.xlu2 %v925_v61 }
 0x3cd   : > { %v781_v62 = vpop.f32.mrf.mxu3 }
 0x3ce   : > { %v787_v63 = vsel %vm659_vm1, %v781_v62, -inf }
 0x3cf   : > { %788 = vmax.xlane.f32.xlu0 %v787_v63 }
 0x3d1   : > { %v922_v0 = vpop.f32.mrf.mxu2 }
 0x3d2   : > { %v928_v3 = vsel %vm659_vm1, %v922_v0, -inf }
 0x3d5   : > { %v1060_v1 = vpop.f32.mrf.mxu3 }
 0x3d6   : > { %v1066_v2 = vsel %vm659_vm1, %v1060_v1, -inf }
 0x3d7   : > { %1067 = vmax.xlane.f32.xlu1 %v1066_v2  ;;  %929 = vmax.xlane.f32.xlu0 %v928_v3 }
 0x3dd   : > { %v1063_v4 = vpop.f32.mrf.mxu3 }
 0x3de   : > { %v1069_v5 = vsel %vm659_vm1, %v1063_v4, -inf }
 0x3df   : > { %1070 = vmax.xlane.f32.xlu2 %v1069_v5 }
 0x43a   : > { %v786_v6 = vpop.xlane.xlu1 %785 }
 0x43b   : > { %v790_v7 = vsub.f32 %v778_v58, %v786_v6 }
 0x43d   : > { %v792_v8 = vmul.f32 1.442695, %v790_v7 }
 0x43e   : > { %v927_v9 = vpop.xlane.xlu2 %926 }
 0x43f   : > { %1560 = vpow2.f32 %v792_v8  ;;  %v931_v10 = vsub.f32 %v919_v60, %v927_v9 }
 0x441   : > { %v933_v11 = vmul.f32 1.442695, %v931_v10 }
 0x442   : > { %v789_v12 = vpop.xlane.xlu0 %788 }
 0x443   : > { %1562 = vpow2.f32 %v933_v11  ;;  %v791_v13 = vsub.f32 %v781_v62, %v789_v12 }
 0x445   : > { %v2194_v14 = vpop.eup %1560  ;;  %v794_v15 = vmul.f32 1.442695, %v791_v13 }
 0x446   : > { %v796_v16 = vsel %vm659_vm1, %v2194_v14, 0.0 }
 0x447   : > { %1564 = vpow2.f32 %v794_v15  ;;  %797 = vadd.xlane.f32.xlu1 %v796_v16 }
 0x449   : > { %v2198_v17 = vpop.eup %1562 }
 0x44a   : > { %v1068_v18 = vpop.xlane.xlu1 %1067  ;;  %v930_v19 = vpop.xlane.xlu0 %929  ;;  %v937_v21 = vsel %vm659_vm1, %v2198_v17, 0.0 }
 0x44b   : > { %v1072_v22 = vsub.f32 %v1060_v1, %v1068_v18  ;;  %v932_v23 = vsub.f32 %v922_v0, %v930_v19  ;;  %938 = vadd.xlane.f32.xlu2 %v937_v21 }
 0x44d   : > { %v2202_v24 = vpop.eup %1564  ;;  %v1074_v25 = vmul.f32 1.442695, %v1072_v22  ;;  %v935_v26 = vmul.f32 1.442695, %v932_v23 }
 0x44e   : > { %v799_v27 = vsel %vm659_vm1, %v2202_v24, 0.0 }
 0x44f   : > { %1566 = vpow2.f32 %v1074_v25  ;;  %800 = vadd.xlane.f32.xlu0 %v799_v27 }
 0x450   : > { %1568 = vpow2.f32 %v935_v26 }
 0x452   : > { %v1071_v28 = vpop.xlane.xlu2 %1070 }
 0x453   : > { %v1073_v29 = vsub.f32 %v1063_v4, %v1071_v28 }
 0x455   : > { %v2206_v30 = vpop.eup %1566  ;;  %v1076_v31 = vmul.f32 1.442695, %v1073_v29 }
 0x456   : > { %v2208_v32 = vpop.eup %1568  ;;  %v1078_v33 = vsel %vm659_vm1, %v2206_v30, 0.0 }
 0x457   : > { %1570 = vpow2.f32 %v1076_v31  ;;  %1079 = vadd.xlane.f32.xlu1 %v1078_v33  ;;  %v940_v34 = vsel %vm659_vm1, %v2208_v32, 0.0 }
 0x458   : > { %941 = vadd.xlane.f32.xlu2 %v940_v34 }
 0x45d   : > { %v2214_v35 = vpop.eup %1570 }
 0x45e   : > { %v1081_v36 = vsel %vm659_vm1, %v2214_v35, 0.0 }
 0x45f   : > { %1082 = vadd.xlane.f32.xlu1 %v1081_v36 }
 0x463   : > { %1535 = vrot.lane.b32.xlu0 %v2171_v20, %s1886_s5 }
 0x470   : > { %1540 = vrot.lane.b32.xlu2 %v2171_v20, %s1887_s6 }
 0x478   : > { %1545 = vrot.lane.b32.xlu1 %v2171_v20, %s1888_s16 }
 0x4ba   : > { %v798_v37 = vpop.xlane.xlu1 %797 }
 0x4bb   : > { %1572 = vrcp.f32 %v798_v37  ;;  %v813_v55 = vand.u32 2147483648, %v798_v37  ;;  %vm807_vm14 = vweird.f32 %v798_v37  ;;  %v811_v58 = vand.u32 2147483647, %v798_v37 }
 0x4bd   : > { %v814_v63 = vor.u32 1.1754944e-38, %v813_v55  ;;  %vm812_vm2 = vcmp.eq.f32.partialorder %v811_v58, 8.507059e+37  ;;  %v1177_v58 = vld [vmem:[#allocation16 + $0x68] sm:$0xff] }
 0x4be   : > { %v939_v38 = vpop.xlane.xlu2 %938 }
 0x4bf   : > { %1574 = vrcp.f32 %v939_v38  ;;  %v954_v52 = vand.u32 2147483648, %v939_v38  ;;  %vm948_vm11 = vweird.f32 %v939_v38  ;;  %v952_v53 = vand.u32 2147483647, %v939_v38 }
 0x4c1   : > { %v1573_v39 = vpop.eup %1572  ;;  %v955_v59 = vor.u32 1.1754944e-38, %v954_v52  ;;  %vm953_vm0 = vcmp.eq.f32.partialorder %v952_v53, 8.507059e+37 }
 0x4c2   : > { %v803_v40 = vmul.f32 %v1573_v39, %v798_v37  ;;  %v2224_v41 = vpop.xlane.xlu0 %800  ;;  %vm808_vm12 = vweird.f32 %v1573_v39 }
 0x4c3   : > { %1576 = vrcp.f32 %v2224_v41  ;;  %vm2234_vm15 = vmor %vm807_vm14, %vm808_vm12  ;;  %vm822_vm5 = vweird.f32 %v2224_v41  ;;  %v828_v19 = vand.u32 2147483648, %v2224_v41  ;;  %v826_v25 = vand.u32 2147483647, %v2224_v41 }
 0x4c4   : > { %v804_v43 = vsub.f32 1.0, %v803_v40 }
 0x4c5   : > { %v1575_v42 = vpop.eup %1574  ;;  %v829_v29 = vor.u32 1.1754944e-38, %v828_v19 }
 0x4c6   : > { %v944_v44 = vmul.f32 %v1575_v42, %v939_v38  ;;  %v805_v47 = vmul.f32 %v1573_v39, %v804_v43  ;;  %vm949_vm10 = vweird.f32 %v1575_v42 }
 0x4c7   : > { %vm950_vm13 = vmor %vm948_vm11, %vm949_vm10  ;;  %vm827_vm10 = vcmp.eq.f32.partialorder %v826_v25, 8.507059e+37 }
 0x4c8   : > { %v945_v45 = vsub.f32 1.0, %v944_v44  ;;  %v806_v54 = vadd.f32 %v1573_v39, %v805_v47 }
 0x4c9   : > { %v2227_v46 = vpop.eup %1576 }
 0x4ca   : > { %v946_v48 = vmul.f32 %v1575_v42, %v945_v45  ;;  %v2229_v49 = vpop.xlane.xlu1 %1079  ;;  %v818_v20 = vmul.f32 %v2227_v46, %v2224_v41  ;;  %v810_v62 = vsel %vm2234_vm15, %v1573_v39, %v806_v54  ;;  %vm823_vm3 = vweird.f32 %v2227_v46 }
 0x4cb   : > { %v942_v50 = vpop.xlane.xlu2 %941  ;;  %v815_v10 = vsel %vm812_vm2, %v814_v63, %v810_v62  ;;  %vm824_vm7 = vmor %vm822_vm5, %vm823_vm3  ;;  %vm1089_vm12 = vweird.f32 %v2229_v49  ;;  %v1093_v43 = vand.u32 2147483647, %v2229_v49  ;;  %vm1159_vm5 = vcmask 1048320  }
 0x4cc   : > { %v947_v51 = vadd.f32 %v1575_v42, %v946_v48  ;;  %1578 = vrcp.f32 %v942_v50  ;;  %v819_v56 = vsub.f32 1.0, %v818_v20  ;;  %v969_v8 = vand.u32 2147483648, %v942_v50 }
 0x4cd   : > { %1580 = vrcp.f32 %v2229_v49  ;;  %v967_v15 = vand.u32 2147483647, %v942_v50  ;;  %vm963_vm6 = vweird.f32 %v942_v50  ;;  %vm1094_vm14 = vcmp.eq.f32.partialorder %v1093_v43, 8.507059e+37 }
 0x4ce   : > { %v951_v57 = vsel %vm950_vm13, %v1575_v42, %v947_v51  ;;  %v820_v1 = vmul.f32 %v2227_v46, %v819_v56  ;;  %v970_v26 = vor.u32 1.1754944e-38, %v969_v8  ;;  %v1095_v42 = vand.u32 2147483648, %v2229_v49  ;;  %v1179_v56 = vld [vmem:[#allocation16 + $0x78] sm:$0xff] }
 0x4cf   : > { %v956_v0 = vsel %vm953_vm0, %v955_v59, %v951_v57  ;;  %vm968_vm9 = vcmp.eq.f32.partialorder %v967_v15, 8.507059e+37  ;;  %v1178_v57 = vld [vmem:[#allocation16 + $0x70] sm:$0xff]  ;;  %1184 = vmatpush.msrb.mxu1 %v1179_v56  ;;  %v1167_v8 = vld [vmem:[#allocation16 + $0x18] sm:$0xff] }
 0x4d0   : > { %v957_v13 = vmul.f32 %v2198_v17, %v956_v0  ;;  %v821_v18 = vadd.f32 %v2227_v46, %v820_v1  ;;  %v816_v17 = vmul.f32 %v2194_v14, %v815_v10  ;;  %v1096_v45 = vor.u32 1.1754944e-38, %v1095_v42  ;;  %v1175_v0 = vld [vmem:[#allocation16 + $0x58] sm:$0xff]  ;;  %v1174_v1 = vld [vmem:[#allocation16 + $0x50] sm:$0xff]  ;;  %v1165_v10 = vld [vmem:[#allocation16 + $0x8] sm:$0xff] }
 0x4d1   : > { %1185 = vmatpush.msrb.mxu1 %v1178_v57 }
 0x4d2   : > { %v1579_v61 = vpop.eup %1578  ;;  %v2241_v4 = vpop.xlane.xlu1 %1082  ;;  %v825_v28 = vsel %vm824_vm7, %v2227_v46, %v821_v18 }
 0x4d3   : > { %v959_v2 = vmul.f32 %v1579_v61, %v942_v50  ;;  %v1541_v3 = vpop.permute.xlu2 %1540  ;;  %v1581_v6 = vpop.eup %1580  ;;  %1582 = vrcp.f32 %v2241_v4  ;;  %vm964_vm4 = vweird.f32 %v1579_v61  ;;  %v830_v34 = vsel %vm827_vm10, %v829_v29, %v825_v28  ;;  %1186 = vmatpush.msrb.mxu1 %v1177_v58 }
 0x4d4   : > { %v1542_v5 = vunpack.i.l.bf16 %v1541_v3  ;;  %v1543_v11 = vunpack.i.h.bf16 %v1541_v3  ;;  %v1085_v21 = vmul.f32 %v1581_v6, %v2229_v49  ;;  %vm965_vm8 = vmor %vm963_vm6, %vm964_vm4  ;;  %v831_v39 = vmul.f32 %v2202_v24, %v830_v34  ;;  %v1172_v3 = vld [vmem:[#allocation16 + $0x40] sm:$0xff] }
 0x4d5   : > { %v960_v7 = vsub.f32 1.0, %v959_v2  ;;  %v1536_v9 = vpop.permute.xlu0 %1535  ;;  %vm1090_vm11 = vweird.f32 %v1581_v6  ;;  %v1110_v20 = vand.u32 2147483648, %v2241_v4  ;;  %vm1104_vm0 = vweird.f32 %v2241_v4  ;;  %v1173_v2 = vld [vmem:[#allocation16 + $0x48] sm:$0xff] }
 0x4d6   : > { %1001 = vmatpush.msra.mxu2 %v1542_v5  ;;  %v1537_v12 = vunpack.i.l.bf16 %v1536_v9  ;;  %v1538_v22 = vunpack.i.h.bf16 %v1536_v9  ;;  %v1086_v31 = vsub.f32 1.0, %v1085_v21  ;;  %vm1091_vm13 = vmor %vm1089_vm12, %vm1090_vm11  ;;  %v1108_v49 = vand.u32 2147483647, %v2241_v4  ;;  %v1170_v5 = vld [vmem:[#allocation16 + $0x30] sm:$0xff] }
 0x4d7   : > { %v961_v16 = vmul.f32 %v1579_v61, %v960_v7  ;;  %v1111_v53 = vor.u32 1.1754944e-38, %v1110_v20  ;;  %v1168_v7 = vld [vmem:[#allocation16 + $0x20] sm:$0xff]  ;;  %v1166_v9 = vld [vmem:[#allocation16 + $0x10] sm:$0xff]  ;;  %vm1018_vm4 = vcmask 785920  }
 0x4d8   : > { %1002 = vmatpush.msra.mxu2 %v1543_v11  ;;  %860 = vmatpush.msrb.mxu0 %v1537_v12  ;;  %v1087_v37 = vmul.f32 %v1581_v6, %v1086_v31  ;;  %vm1109_vm3 = vcmp.eq.f32.partialorder %v1108_v49, 8.507059e+37  ;;  %v1164_v11 = vld [vmem:[#allocation16] sm:$0xff] }
 0x4d9   : > { %1404 = vmatmul.msk.f32.vlgmr.msra.gmra.mxu2 %vm659_vm1, %v957_v13  ;;  %v962_v23 = vadd.f32 %v1579_v61, %v961_v16  ;;  %v1583_v14 = vpop.eup %1582 }
 0x4da   : > { %861 = vmatpush.msrb.mxu0 %v1538_v22  ;;  %v1100_v38 = vmul.f32 %v1583_v14, %v2241_v4  ;;  %v1088_v40 = vadd.f32 %v1581_v6, %v1087_v37  ;;  %vm1105_vm15 = vweird.f32 %v1583_v14  ;;  %v1171_v4 = vld [vmem:[#allocation16 + $0x38] sm:$0xff] }
 0x4db   : > { %1398 = vmatmul.msk.f32.vlgmr.msrb.gmra.mxu0 %vm659_vm1, %v816_v17  ;;  %v966_v27 = vsel %vm965_vm8, %v1579_v61, %v962_v23  ;;  %vm1106_vm2 = vmor %vm1104_vm0, %vm1105_vm15  ;;  %v1551_v17 = vld [vmem:[%s2333_s10] ss:$0 sm:$0xff] }
 0x4dc   : > { %v971_v33 = vsel %vm968_vm9, %v970_v26, %v966_v27  ;;  %v1101_v41 = vsub.f32 1.0, %v1100_v38  ;;  %v1092_v44 = vsel %vm1091_vm13, %v1581_v6, %v1088_v40  ;;  %v1169_v6 = vld [vmem:[#allocation16 + $0x28] sm:$0xff] }
 0x4dd   : > { %v972_v36 = vmul.f32 %v2208_v32, %v971_v33  ;;  %v1097_v48 = vsel %vm1094_vm14, %v1096_v45, %v1092_v44 }
 0x4de   : > { %v1102_v32 = vmul.f32 %v1583_v14, %v1101_v41  ;;  %v1098_v51 = vmul.f32 %v2206_v30, %v1097_v48  ;;  %v1176_v30 = vld [vmem:[#allocation16 + $0x60] sm:$0xff] }
 0x4df   : > { %1187 = vmatpush.msrb.mxu1 %v1176_v30 }
 0x4e0   : > { %v1103_v24 = vadd.f32 %v1583_v14, %v1102_v32 }
 0x4e1   : > { %1405 = vmatmul.msk.f32.gmra.mxu2 %vm659_vm1, %v972_v36  ;;  %1188 = vmatpush.msrb.mxu1 %v1175_v0 }
 0x4e2   : > { %v1107_v52 = vsel %vm1106_vm2, %v1583_v14, %v1103_v24 }
 0x4e3   : > { %1399 = vmatmul.msk.f32.gmra.mxu0 %vm659_vm1, %v831_v39  ;;  %v1112_v54 = vsel %vm1109_vm3, %v1111_v53, %v1107_v52  ;;  %1189 = vmatpush.msrb.mxu1 %v1174_v1 }
 0x4e4   : > { %v1113_v55 = vmul.f32 %v2214_v35, %v1112_v54 }
 0x4e5   : > { %1190 = vmatpush.msrb.mxu1 %v1173_v2 }
 0x4e7   : > { %1191 = vmatpush.msrb.mxu1 %v1172_v3 }
 0x4e9   : > { %1192 = vmatpush.msrb.mxu1 %v1171_v4 }
 0x4ea   : > { %v1546_v46 = vpop.permute.xlu1 %1545 }
 0x4eb   : > { %v1547_v47 = vunpack.i.l.bf16 %v1546_v46  ;;  %v1548_v50 = vunpack.i.h.bf16 %v1546_v46  ;;  %1193 = vmatpush.msrb.mxu1 %v1170_v5 }
 0x4ed   : > { %1142 = vmatpush.msra.mxu0 %v1547_v47  ;;  %1194 = vmatpush.msrb.mxu1 %v1169_v6 }
 0x4ef   : > { %1143 = vmatpush.msra.mxu0 %v1548_v50  ;;  %1195 = vmatpush.msrb.mxu1 %v1168_v7 }
 0x4f0   : > { %1410 = vmatmul.msk.f32.vlgmr.msra.gmra.mxu0 %vm659_vm1, %v1098_v51 }
 0x4f1   : > { %1196 = vmatpush.msrb.mxu1 %v1167_v8 }
 0x4f3   : > { %1197 = vmatpush.msrb.mxu1 %v1166_v9 }
 0x4f5   : > { %1198 = vmatpush.msrb.mxu1 %v1165_v10 }
 0x4f7   : > { %1199 = vmatpush.msrb.mxu1 %v1164_v11 }
 0x4f8   : > { %1411 = vmatmul.msk.f32.gmra.mxu0 %vm659_vm1, %v1113_v55  ;;  %vm877_vm1 = vcmask 523520  }
 0x558   : > { %v863_v59 = vpop.f32.mrf.mxu0 }
 0x55c   : > { %v1004_v60 = vpop.f32.mrf.mxu2 }
 0x55d   : > { %1012 = vrot.lane.b32.xlu0 %v1004_v60, %s1887_s6 }
 0x560   : > { %v866_v62 = vpop.f32.mrf.mxu0 }
 0x564   : > { %v1007_v61 = vpop.f32.mrf.mxu2 }
 0x565   : > { %1014 = vrot.lane.b32.xlu1 %v1007_v61, %s1887_s6  ;;  %871 = vrot.lane.b32.xlu0 %v863_v59, %s1888_s16  ;;  %s1796_s6 = sshra.s32 %s1227_s15, 4  ;;  %s1797_s6 = int_to_ptr.hbm [resolvable:$true] %s1796_s6 }
 0x566   : > { %s1798_s26 = scalar_lea.hbm %s1797_s6, 16  ;;  %p1803_p7 = scmp.lt.s32.totalorder %s1797_s6, %s2367_s12 }
 0x567   : > { %p1799_p9 = scmp.ne.s32.totalorder %s1797_s6, %s1798_s26  ;;  %p1804_p11 = scmp.lt.s32.totalorder %s1802_s4, %s1798_s26 }
 0x569   : > { %p1800_p3 = pnand %p1799_p9, %p2057_p2  ;;  %p1805_p12 = por %p1804_p11, %p1803_p7 }
 0x56b   : > { %p1801_p1 = pneg %p1800_p3 }
 0x56d   : > { %873 = vrot.lane.b32.xlu0 %v866_v62, %s1888_s16  ;;  %v1145_v35 = vpop.f32.mrf.mxu0  ;;  %p1806_p13 = pnand %p1805_p12, %p1801_p1 }
 0x56e   : > { %1153 = vrot.lane.b32.xlu2 %v1145_v35, %s1886_s5 }
 0x575   : > { %v1148_v63 = vpop.f32.mrf.mxu0 }
 0x576   : > { %1155 = vrot.lane.b32.xlu2 %v1148_v63, %s1886_s5  ;;  %s1210_s5 = scalar_lea.sflag [#allocation10], %s2080_s30 }
 0x5c8   : > { %v1154_v13 = vpop.permute.xlu2 %1153 }
 0x5cf   : > { %v1013_v12 = vpop.permute.xlu0 %1012 }
 0x5d0   : > { %v1156_v19 = vpop.permute.xlu2 %1155 }
 0x5d7   : > { %v872_v15 = vpop.permute.xlu0 %871  ;;  %v1015_v18 = vpop.permute.xlu1 %1014 }
 0x5d8   : > { %878 = vst.msk [vmem:[#allocation6] sm:$0xff] %vm877_vm1, %v872_v15 }
 0x5d9   : > { %1019 = vst.msk [vmem:[#allocation6] sm:$0xff] %vm1018_vm4, %v1013_v12 }
 0x5da   : > { %1160 = vst.msk [vmem:[#allocation6] sm:$0xff] %vm1159_vm5, %v1154_v13 }
 0x5df   : > { %v874_v16 = vpop.permute.xlu0 %873 }
 0x5e0   : > { %879 = vst.msk [vmem:[#allocation6 + $0x8] sm:$0xff] %vm877_vm1, %v874_v16 }
 0x5e1   : > { %1020 = vst.msk [vmem:[#allocation6 + $0x8] sm:$0xff] %vm1018_vm4, %v1015_v18  ;;  %v1162_v21 = vld [vmem:[#allocation6] sm:$0xff] }
 0x5e2   : > { %1161 = vst.msk [vmem:[#allocation6 + $0x8] sm:$0xff] %vm1159_vm5, %v1156_v19  ;;  %1200 = vmatmul.f32.vlgmr.msrb.gmra.mxu1 %v1162_v21 }
 0x5e9   : > { %v1163_v22 = vld [vmem:[#allocation6 + $0x8] sm:$0xff] }
 0x5ea   : > { %1203 = vmatmul.f32.gmra.mxu1 %v1163_v22 }
 0x65f   : > { %v1201_v23 = vpop.f32.mrf.mxu1 }
 0x660   : > { %v1202_v25 = vadd.f32 %v1551_v17, %v1201_v23 }
 0x662   : > { %1207 = vst [vmem:[%s2125_s3] sm:$0xff] %v1202_v25 }
 0x667   : > { %v1204_v26 = vpop.f32.mrf.mxu1 }
 0x668   : > { %v1205_v27 = vadd.f32 %v1551_v17, %v1204_v26 }
 0x66a   : > { %1208 = vst [vmem:[%s2125_s3 + $0x8] sm:$0xff] %v1205_v27 }
 0x66b   : > { %1809 = shalt.err (!%p1806_p13)
}
 0x66c   : > { %s1889_s30 = smov 128   ;;  %s1890_s3 = smov 8  }
 0x66d   : > { %1439 = dma.vmem_to_hbm [thread:$0]  (%p2057_p2), %s1225_s23, 256, %s1227_s15, %s1210_s5, %s1889_s30, %s1889_s30, %s1890_s3  }
 0x66e PF: > { %s2368_s14 = sld [smem:[#allocation30_spill]]  ;;  %p1459_p0 = pnand %p1376_p10, %p1998_p5 }
 0x670   : > { %p1460_p4 = pneg %p1459_p0 }
 0x674   : > { %s1241_s27 = sand.u32 1, %s2368_s14  }
 0x675   : > { %s1242_s20 = scalar_lea.sflag [#allocation10], %s1241_s27 }
 0x676   : > { %1851 = dma.done.wait (%p1460_p4), %s1242_s20, 256  }
 0x677   : > { %1853 = vsyncadd (%p1460_p4), %s1242_s20, 4294967040  ;;  %s29_s22 = sadd.s32 1, %s1876_s22   ;;  %s2370_s11 = sld [smem:[#allocation32_spill]] }
 0x678   : > { %p26_p6 = scmp.ge.s32.totalorder %s29_s22, 4   ;;  %s2371_s17 = smov %s1860_s18 }
 0x679   : > { %s2372_s18 = smov %s1864_s19  ;;  %s2373_s19 = smov %s2067_s13 }
 0x67a   : > { %s2374_s20 = smov %s1872_s21  ;;  %28 = sbr.rel (!%p26_p6) target bundleno = 14 (0xe), region = 133 }
 0x67d   : > { %s2375_s21 = smov %s2370_s11 }
 0x67f   :  { %1248 = vsyncpa [#allocation9], 1 }
 0x680   :  { %1250 = vsyncpa [#allocation9 + $0x1], 1 }
 0x681   :  { %1251 = vsyncpa [#allocation12], 1 }
 0x682   :  { %1252 = vsyncpa [#allocation15], 1 }
 0x683   :  { %1253 = vsyncpa [#allocation10], 1 }
 0x684   :  { %1255 = vsyncpa [#allocation10 + $0x1], 1 }
 0x685   :  { %1256 = vsyncmov [#allocation7] }
 0x688   :  { %s1257_s28 = vpop.sfrf %1256 }
 0x689   :  { %p1417_p5 = scmp.ne.s32.totalorder %s1257_s28, 0 }
 0x68b   :  { %1261 = shalt.err (%p1417_p5)  }
 0x68c   :  { %1263 = vsyncmov [#allocation7 + $0x1] }
 0x68f   :  { %s1264_s23 = vpop.sfrf %1263 }
 0x690   :  { %p1418_p10 = scmp.ne.s32.totalorder %s1264_s23, 0 }
 0x692   :  { %1268 = shalt.err (%p1418_p10)  }

</bundles_post_ra>
